<compile_context>
chip_gen: v7x
topology: tpu7x:2x2x1
jax: 0.10.0
libtpu: 0.0.40
codegen_flags: <defaults>
</compile_context>

<pallas_src>
import jax
import jax.numpy as jnp
from jax.experimental import pallas as pl
from jax.experimental.pallas import tpu as pltpu  # noqa: F401

_LANE = 128
_SUBLANE = 8


def _round_up(x, m):
    return (x + m - 1) // m * m


def _char_decoder_kernel(ids_ref, emb_ref, wih_ref, whh_ref, b_ref,
                         wproj_ref, bproj_ref, wout_ref, bout_ref,
                         h0_ref, c0_ref,
                         scores_ref, h_out_ref, c_out_ref):
    LB = ids_ref.shape[0]            # L * Bp (static)
    Bp, Hp = h0_ref.shape            # padded batch / hidden (static)
    L = LB // Bp
    Vp = emb_ref.shape[0]            # padded vocab (static)

    # --- 1) Fused embedding lookup: one-hot(ids) @ emb_table on the MXU. ----
    ids = ids_ref[...]                                             # (L*Bp, 1) int32
    iota = jax.lax.broadcasted_iota(jnp.int32, (LB, Vp), 1)
    onehot = (iota == ids).astype(jnp.float32)                     # (L*Bp, Vp)
    emb_all = jnp.dot(onehot, emb_ref[...],
                      preferred_element_type=jnp.float32)          # (L*Bp, Ep)

    # --- 2) Input-to-gates projection for ALL timesteps in one MXU call. ----
    gx_all = jnp.dot(emb_all, wih_ref[...],
                     preferred_element_type=jnp.float32) + b_ref[...]   # (L*Bp, 4*Hp)

    whh = whh_ref[...]               # (Hp, 4*Hp), stays resident
    h = h0_ref[...]                  # (Bp, Hp) f32
    c = c0_ref[...]                  # (Bp, Hp) f32

    # --- 3) Recurrence: fully unrolled, only h @ W_hh per step on the MXU. ---
    hs = []
    for t in range(L):
        gates = gx_all[t * Bp:(t + 1) * Bp, :] + jnp.dot(
            h, whh, preferred_element_type=jnp.float32)            # (Bp, 4*Hp)

        # Lane-tile-aligned gate slices (Hp is a multiple of 128).
        i_g = jax.nn.sigmoid(gates[:, 0 * Hp:1 * Hp])
        f_g = jax.nn.sigmoid(gates[:, 1 * Hp:2 * Hp])
        g_g = jnp.tanh(gates[:, 2 * Hp:3 * Hp])
        o_g = jax.nn.sigmoid(gates[:, 3 * Hp:4 * Hp])

        c = f_g * c + i_g * g_g
        h = o_g * jnp.tanh(c)
        hs.append(h)

    h_out_ref[...] = h
    c_out_ref[...] = c

    # --- 4) Batched output projections over all L*Bp rows at once. ----------
    hs_all = jnp.concatenate(hs, axis=0)                           # (L*Bp, Hp)
    proj = jnp.dot(hs_all, wproj_ref[...],
                   preferred_element_type=jnp.float32) + bproj_ref[...]
    proj = jnp.maximum(proj, 0.0)
    scores = jnp.dot(proj, wout_ref[...],
                     preferred_element_type=jnp.float32) + bout_ref[...]
    scores_ref[...] = scores.astype(scores_ref.dtype)              # one lane-dense store


def char_decoder_forward(input_ids, params, dec_hidden=None):
    """input_ids: (L, B) int32. Returns (scores (L,B,V), (h (1,B,H), c (1,B,H)))."""
    L, B = input_ids.shape
    emb_table = params["emb"]                     # (V, E)
    V, E = emb_table.shape
    H = params["w_hh"].shape[0]

    Ep = _round_up(E, _LANE)
    Hp = _round_up(H, _LANE)
    Vp = _round_up(V, _LANE)
    Bp = _round_up(B, _SUBLANE)

    def pad_to(x, shape):
        return jnp.pad(x, [(0, s - d) for d, s in zip(x.shape, shape)])

    # Embedding table padded on both axes (vocab -> Vp for one-hot matmul,
    # embed -> Ep for lane density).
    emb_p = pad_to(emb_table.astype(jnp.float32), (Vp, Ep))

    # Ids padded on the batch axis (pad rows compute garbage, sliced off later)
    # and flattened to (L*Bp, 1) so the kernel can lane-broadcast them.
    ids_p = jnp.pad(input_ids.astype(jnp.int32), ((0, 0), (0, Bp - B)))
    ids_flat = ids_p.reshape(L * Bp, 1)

    # Pad LSTM weights per gate block so gate slices are 128-lane aligned.
    def pad_gate_weights(w, in_dim, in_dim_p):
        w4 = w.reshape(in_dim, 4, H)
        w4 = jnp.pad(w4, ((0, in_dim_p - in_dim), (0, 0), (0, Hp - H)))
        return w4.reshape(in_dim_p, 4 * Hp)

    w_ih_p = pad_gate_weights(params["w_ih"], E, Ep)            # (Ep, 4*Hp)
    w_hh_p = pad_gate_weights(params["w_hh"], H, Hp)            # (Hp, 4*Hp)
    b_lstm = (params["b_ih"] + params["b_hh"]).reshape(4, H)
    b_lstm = jnp.pad(b_lstm, ((0, 0), (0, Hp - H))).reshape(1, 4 * Hp)

    w_proj_p = pad_to(params["w_proj"], (Hp, Hp))
    b_proj_p = pad_to(params["b_proj"].reshape(1, H), (1, Hp))
    w_out_p = pad_to(params["w_out"], (Hp, Vp))
    b_out_p = pad_to(params["b_out"].reshape(1, V), (1, Vp))

    if dec_hidden is None:
        h0 = jnp.zeros((Bp, Hp), jnp.float32)
        c0 = jnp.zeros((Bp, Hp), jnp.float32)
    else:
        h0 = pad_to(dec_hidden[0].reshape(B, H).astype(jnp.float32), (Bp, Hp))
        c0 = pad_to(dec_hidden[1].reshape(B, H).astype(jnp.float32), (Bp, Hp))

    # Single kernel invocation, no grid: every operand trivially fits in VMEM.
    scores_p, h_n_p, c_n_p = pl.pallas_call(
        _char_decoder_kernel,
        out_shape=(
            jax.ShapeDtypeStruct((L * Bp, Vp), jnp.float32),
            jax.ShapeDtypeStruct((Bp, Hp), jnp.float32),
            jax.ShapeDtypeStruct((Bp, Hp), jnp.float32),
        ),
    )(ids_flat, emb_p, w_ih_p, w_hh_p, b_lstm,
      w_proj_p, b_proj_p, w_out_p, b_out_p, h0, c0)

    scores = scores_p.reshape(L, Bp, Vp)[:, :B, :V]
    h_n = h_n_p[:B, :H].reshape(1, B, H)
    c_n = c_n_p[:B, :H].reshape(1, B, H)
    return scores, (h_n, c_n)


def _reference_forward(input_ids, params, dec_hidden=None):
    """Pure-JAX reference (lax.scan) for verification."""
    L, B = input_ids.shape
    H = params["w_hh"].shape[0]
    x = params["emb"][input_ids]                  # (L, B, E)
    if dec_hidden is None:
        h0 = jnp.zeros((B, H), jnp.float32)
        c0 = jnp.zeros((B, H), jnp.float32)
    else:
        h0, c0 = dec_hidden[0].reshape(B, H), dec_hidden[1].reshape(B, H)
    b = params["b_ih"] + params["b_hh"]

    def step(carry, x_t):
        h, c = carry
        gates = x_t @ params["w_ih"] + h @ params["w_hh"] + b
        i_g = jax.nn.sigmoid(gates[:, 0 * H:1 * H])
        f_g = jax.nn.sigmoid(gates[:, 1 * H:2 * H])
        g_g = jnp.tanh(gates[:, 2 * H:3 * H])
        o_g = jax.nn.sigmoid(gates[:, 3 * H:4 * H])
        c_n = f_g * c + i_g * g_g
        h_n = o_g * jnp.tanh(c_n)
        return (h_n, c_n), h_n

    (h_n, c_n), outs = jax.lax.scan(step, (h0, c0), x)
    proj = jnp.maximum(outs @ params["w_proj"] + params["b_proj"], 0.0)
    scores = proj @ params["w_out"] + params["b_out"]
    return scores, (h_n[None], c_n[None])


def make_params(key, vocab_size, char_embedding_size, hidden_size, pad_idx=0):
    ks = jax.random.split(key, 9)
    E, H, V = char_embedding_size, hidden_size, vocab_size
    scale = 0.1
    emb = scale * jax.random.normal(ks[0], (V, E), jnp.float32)
    emb = emb.at[pad_idx].set(0.0)                # mimic padding_idx init
    params = dict(
        emb=emb,
        # stored transposed (in, out) relative to PyTorch's (4H, in)
        w_ih=scale * jax.random.normal(ks[1], (E, 4 * H), jnp.float32),
        w_hh=scale * jax.random.normal(ks[2], (H, 4 * H), jnp.float32),
        b_ih=scale * jax.random.normal(ks[3], (4 * H,), jnp.float32),
        b_hh=scale * jax.random.normal(ks[4], (4 * H,), jnp.float32),
        w_proj=scale * jax.random.normal(ks[5], (H, H), jnp.float32),
        b_proj=scale * jax.random.normal(ks[6], (H,), jnp.float32),
        w_out=scale * jax.random.normal(ks[7], (H, V), jnp.float32),
        b_out=scale * jax.random.normal(ks[8], (V,), jnp.float32),
    )
    return params


if __name__ == "__main__":
    # Small, deterministic setup.
    L, B = 8, 8            # (length, batch)
    H = 32                 # hidden_size
    E = 32                 # char_embedding_size
    V = 64                 # len(target_vocab.char2id)
    pad_idx = 0

    key = jax.random.PRNGKey(0)
    kp, ki, kh, kc = jax.random.split(key, 4)
    params = make_params(kp, V, E, H, pad_idx=pad_idx)
    input_ids = jax.random.randint(ki, (L, B), 0, V, dtype=jnp.int32)
    dec_hidden = (0.1 * jax.random.normal(kh, (1, B, H), jnp.float32),
                  0.1 * jax.random.normal(kc, (1, B, H), jnp.float32))

    scores, (h_n, c_n) = char_decoder_forward(input_ids, params, dec_hidden)
    jax.block_until_ready((scores, h_n, c_n))

    # Verify against pure-JAX reference.
    scores_ref, (h_ref, c_ref) = _reference_forward(input_ids, params, dec_hidden)
    assert scores.shape == (L, B, V) and h_n.shape == (1, B, H) and c_n.shape == (1, B, H)
    assert jnp.allclose(scores, scores_ref, atol=1e-5, rtol=1e-5)
    assert jnp.allclose(h_n, h_ref, atol=1e-5, rtol=1e-5)
    assert jnp.allclose(c_n, c_ref, atol=1e-5, rtol=1e-5)

    print("KERNEL_OK")
</pallas_src>

<mosaic_0001>
module attributes {stable_mosaic.version = 11 : i64} {
  func.func @_char_decoder_kernel(%arg0: memref<64x1xi32, #tpu.memory_space<vmem>>, %arg1: memref<128x128xf32, #tpu.memory_space<vmem>>, %arg2: memref<128x512xf32, #tpu.memory_space<vmem>>, %arg3: memref<128x512xf32, #tpu.memory_space<vmem>>, %arg4: memref<1x512xf32, #tpu.memory_space<vmem>>, %arg5: memref<128x128xf32, #tpu.memory_space<vmem>>, %arg6: memref<1x128xf32, #tpu.memory_space<vmem>>, %arg7: memref<128x128xf32, #tpu.memory_space<vmem>>, %arg8: memref<1x128xf32, #tpu.memory_space<vmem>>, %arg9: memref<8x128xf32, #tpu.memory_space<vmem>>, %arg10: memref<8x128xf32, #tpu.memory_space<vmem>>, %arg11: memref<64x128xf32, #tpu.memory_space<vmem>>, %arg12: memref<8x128xf32, #tpu.memory_space<vmem>>, %arg13: memref<8x128xf32, #tpu.memory_space<vmem>>) attributes {dimension_semantics = [], scalar_prefetch = 0 : i64, scratch_operands = 0 : i64, tpu.core_type = #tpu.core_type<tc>} {
    %c0 = arith.constant 0 : index
    %c0_0 = arith.constant 0 : index
    %0 = vector.load %arg0[%c0, %c0_0] : memref<64x1xi32, #tpu.memory_space<vmem>>, vector<64x1xi32>
    %1 = tpu.iota {dimensions = array<i32: 1>} : vector<64x128xi32>
    %2 = vector.broadcast %0 : vector<64x1xi32> to vector<64x128xi32>
    %3 = arith.cmpi eq, %1, %2 : vector<64x128xi32>
    %4 = arith.extui %3 : vector<64x128xi1> to vector<64x128xi32>
    %5 = arith.sitofp %4 : vector<64x128xi32> to vector<64x128xf32>
    %c0_1 = arith.constant 0 : index
    %c0_2 = arith.constant 0 : index
    %6 = vector.load %arg1[%c0_1, %c0_2] : memref<128x128xf32, #tpu.memory_space<vmem>>, vector<128x128xf32>
    %cst = arith.constant dense<0.000000e+00> : vector<64x128xf32>
    %7 = tpu.matmul %5, %6, %cst {dimension_numbers = #tpu.dot_dimension_numbers<[1], [0], [0], [1], [0, 0, 1, 1], [], []>} : vector<64x128xf32>, vector<128x128xf32>, vector<64x128xf32> -> vector<64x128xf32>
    %c0_3 = arith.constant 0 : index
    %c0_4 = arith.constant 0 : index
    %8 = vector.load %arg2[%c0_3, %c0_4] : memref<128x512xf32, #tpu.memory_space<vmem>>, vector<128x512xf32>
    %cst_5 = arith.constant dense<0.000000e+00> : vector<64x512xf32>
    %9 = tpu.matmul %7, %8, %cst_5 {dimension_numbers = #tpu.dot_dimension_numbers<[1], [0], [0], [1], [0, 0, 1, 1], [], []>} : vector<64x128xf32>, vector<128x512xf32>, vector<64x512xf32> -> vector<64x512xf32>
    %c0_6 = arith.constant 0 : index
    %c0_7 = arith.constant 0 : index
    %10 = vector.load %arg4[%c0_6, %c0_7] : memref<1x512xf32, #tpu.memory_space<vmem>>, vector<1x512xf32>
    %11 = vector.broadcast %10 : vector<1x512xf32> to vector<64x512xf32>
    %12 = arith.addf %9, %11 : vector<64x512xf32>
    %c0_8 = arith.constant 0 : index
    %c0_9 = arith.constant 0 : index
    %13 = vector.load %arg3[%c0_8, %c0_9] : memref<128x512xf32, #tpu.memory_space<vmem>>, vector<128x512xf32>
    %c0_10 = arith.constant 0 : index
    %c0_11 = arith.constant 0 : index
    %14 = vector.load %arg9[%c0_10, %c0_11] : memref<8x128xf32, #tpu.memory_space<vmem>>, vector<8x128xf32>
    %c0_12 = arith.constant 0 : index
    %c0_13 = arith.constant 0 : index
    %15 = vector.load %arg10[%c0_12, %c0_13] : memref<8x128xf32, #tpu.memory_space<vmem>>, vector<8x128xf32>
    %16 = vector.extract_strided_slice %12 {offsets = [0, 0], sizes = [8, 512], strides = [1, 1]} : vector<64x512xf32> to vector<8x512xf32>
    %cst_14 = arith.constant dense<0.000000e+00> : vector<8x512xf32>
    %17 = tpu.matmul %14, %13, %cst_14 {dimension_numbers = #tpu.dot_dimension_numbers<[1], [0], [0], [1], [0, 0, 1, 1], [], []>} : vector<8x128xf32>, vector<128x512xf32>, vector<8x512xf32> -> vector<8x512xf32>
    %18 = arith.addf %16, %17 : vector<8x512xf32>
    %19 = vector.extract_strided_slice %18 {offsets = [0, 0], sizes = [8, 128], strides = [1, 1]} : vector<8x512xf32> to vector<8x128xf32>
    %20 = arith.negf %19 : vector<8x128xf32>
    %21 = math.exp %20 : vector<8x128xf32>
    %cst_15 = arith.constant 1.000000e+00 : f32
    %22 = vector.broadcast %cst_15 : f32 to vector<8x128xf32>
    %23 = arith.addf %22, %21 : vector<8x128xf32>
    %24 = arith.divf %22, %23 : vector<8x128xf32>
    %25 = vector.extract_strided_slice %18 {offsets = [0, 128], sizes = [8, 128], strides = [1, 1]} : vector<8x512xf32> to vector<8x128xf32>
    %26 = arith.negf %25 : vector<8x128xf32>
    %27 = math.exp %26 : vector<8x128xf32>
    %cst_16 = arith.constant 1.000000e+00 : f32
    %28 = vector.broadcast %cst_16 : f32 to vector<8x128xf32>
    %29 = arith.addf %28, %27 : vector<8x128xf32>
    %30 = arith.divf %28, %29 : vector<8x128xf32>
    %31 = vector.extract_strided_slice %18 {offsets = [0, 256], sizes = [8, 128], strides = [1, 1]} : vector<8x512xf32> to vector<8x128xf32>
    %32 = math.tanh %31 : vector<8x128xf32>
    %33 = vector.extract_strided_slice %18 {offsets = [0, 384], sizes = [8, 128], strides = [1, 1]} : vector<8x512xf32> to vector<8x128xf32>
    %34 = arith.negf %33 : vector<8x128xf32>
    %35 = math.exp %34 : vector<8x128xf32>
    %cst_17 = arith.constant 1.000000e+00 : f32
    %36 = vector.broadcast %cst_17 : f32 to vector<8x128xf32>
    %37 = arith.addf %36, %35 : vector<8x128xf32>
    %38 = arith.divf %36, %37 : vector<8x128xf32>
    %39 = arith.mulf %30, %15 : vector<8x128xf32>
    %40 = arith.mulf %24, %32 : vector<8x128xf32>
    %41 = arith.addf %39, %40 : vector<8x128xf32>
    %42 = math.tanh %41 : vector<8x128xf32>
    %43 = arith.mulf %38, %42 : vector<8x128xf32>
    %44 = vector.extract_strided_slice %12 {offsets = [8, 0], sizes = [8, 512], strides = [1, 1]} : vector<64x512xf32> to vector<8x512xf32>
    %cst_18 = arith.constant dense<0.000000e+00> : vector<8x512xf32>
    %45 = tpu.matmul %43, %13, %cst_18 {dimension_numbers = #tpu.dot_dimension_numbers<[1], [0], [0], [1], [0, 0, 1, 1], [], []>} : vector<8x128xf32>, vector<128x512xf32>, vector<8x512xf32> -> vector<8x512xf32>
    %46 = arith.addf %44, %45 : vector<8x512xf32>
    %47 = vector.extract_strided_slice %46 {offsets = [0, 0], sizes = [8, 128], strides = [1, 1]} : vector<8x512xf32> to vector<8x128xf32>
    %48 = arith.negf %47 : vector<8x128xf32>
    %49 = math.exp %48 : vector<8x128xf32>
    %cst_19 = arith.constant 1.000000e+00 : f32
    %50 = vector.broadcast %cst_19 : f32 to vector<8x128xf32>
    %51 = arith.addf %50, %49 : vector<8x128xf32>
    %52 = arith.divf %50, %51 : vector<8x128xf32>
    %53 = vector.extract_strided_slice %46 {offsets = [0, 128], sizes = [8, 128], strides = [1, 1]} : vector<8x512xf32> to vector<8x128xf32>
    %54 = arith.negf %53 : vector<8x128xf32>
    %55 = math.exp %54 : vector<8x128xf32>
    %cst_20 = arith.constant 1.000000e+00 : f32
    %56 = vector.broadcast %cst_20 : f32 to vector<8x128xf32>
    %57 = arith.addf %56, %55 : vector<8x128xf32>
    %58 = arith.divf %56, %57 : vector<8x128xf32>
    %59 = vector.extract_strided_slice %46 {offsets = [0, 256], sizes = [8, 128], strides = [1, 1]} : vector<8x512xf32> to vector<8x128xf32>
    %60 = math.tanh %59 : vector<8x128xf32>
    %61 = vector.extract_strided_slice %46 {offsets = [0, 384], sizes = [8, 128], strides = [1, 1]} : vector<8x512xf32> to vector<8x128xf32>
    %62 = arith.negf %61 : vector<8x128xf32>
    %63 = math.exp %62 : vector<8x128xf32>
    %cst_21 = arith.constant 1.000000e+00 : f32
    %64 = vector.broadcast %cst_21 : f32 to vector<8x128xf32>
    %65 = arith.addf %64, %63 : vector<8x128xf32>
    %66 = arith.divf %64, %65 : vector<8x128xf32>
    %67 = arith.mulf %58, %41 : vector<8x128xf32>
    %68 = arith.mulf %52, %60 : vector<8x128xf32>
    %69 = arith.addf %67, %68 : vector<8x128xf32>
    %70 = math.tanh %69 : vector<8x128xf32>
    %71 = arith.mulf %66, %70 : vector<8x128xf32>
    %72 = vector.extract_strided_slice %12 {offsets = [16, 0], sizes = [8, 512], strides = [1, 1]} : vector<64x512xf32> to vector<8x512xf32>
    %cst_22 = arith.constant dense<0.000000e+00> : vector<8x512xf32>
    %73 = tpu.matmul %71, %13, %cst_22 {dimension_numbers = #tpu.dot_dimension_numbers<[1], [0], [0], [1], [0, 0, 1, 1], [], []>} : vector<8x128xf32>, vector<128x512xf32>, vector<8x512xf32> -> vector<8x512xf32>
    %74 = arith.addf %72, %73 : vector<8x512xf32>
    %75 = vector.extract_strided_slice %74 {offsets = [0, 0], sizes = [8, 128], strides = [1, 1]} : vector<8x512xf32> to vector<8x128xf32>
    %76 = arith.negf %75 : vector<8x128xf32>
    %77 = math.exp %76 : vector<8x128xf32>
    %cst_23 = arith.constant 1.000000e+00 : f32
    %78 = vector.broadcast %cst_23 : f32 to vector<8x128xf32>
    %79 = arith.addf %78, %77 : vector<8x128xf32>
    %80 = arith.divf %78, %79 : vector<8x128xf32>
    %81 = vector.extract_strided_slice %74 {offsets = [0, 128], sizes = [8, 128], strides = [1, 1]} : vector<8x512xf32> to vector<8x128xf32>
    %82 = arith.negf %81 : vector<8x128xf32>
    %83 = math.exp %82 : vector<8x128xf32>
    %cst_24 = arith.constant 1.000000e+00 : f32
    %84 = vector.broadcast %cst_24 : f32 to vector<8x128xf32>
    %85 = arith.addf %84, %83 : vector<8x128xf32>
    %86 = arith.divf %84, %85 : vector<8x128xf32>
    %87 = vector.extract_strided_slice %74 {offsets = [0, 256], sizes = [8, 128], strides = [1, 1]} : vector<8x512xf32> to vector<8x128xf32>
    %88 = math.tanh %87 : vector<8x128xf32>
    %89 = vector.extract_strided_slice %74 {offsets = [0, 384], sizes = [8, 128], strides = [1, 1]} : vector<8x512xf32> to vector<8x128xf32>
    %90 = arith.negf %89 : vector<8x128xf32>
    %91 = math.exp %90 : vector<8x128xf32>
    %cst_25 = arith.constant 1.000000e+00 : f32
    %92 = vector.broadcast %cst_25 : f32 to vector<8x128xf32>
    %93 = arith.addf %92, %91 : vector<8x128xf32>
    %94 = arith.divf %92, %93 : vector<8x128xf32>
    %95 = arith.mulf %86, %69 : vector<8x128xf32>
    %96 = arith.mulf %80, %88 : vector<8x128xf32>
    %97 = arith.addf %95, %96 : vector<8x128xf32>
    %98 = math.tanh %97 : vector<8x128xf32>
    %99 = arith.mulf %94, %98 : vector<8x128xf32>
    %100 = vector.extract_strided_slice %12 {offsets = [24, 0], sizes = [8, 512], strides = [1, 1]} : vector<64x512xf32> to vector<8x512xf32>
    %cst_26 = arith.constant dense<0.000000e+00> : vector<8x512xf32>
    %101 = tpu.matmul %99, %13, %cst_26 {dimension_numbers = #tpu.dot_dimension_numbers<[1], [0], [0], [1], [0, 0, 1, 1], [], []>} : vector<8x128xf32>, vector<128x512xf32>, vector<8x512xf32> -> vector<8x512xf32>
    %102 = arith.addf %100, %101 : vector<8x512xf32>
    %103 = vector.extract_strided_slice %102 {offsets = [0, 0], sizes = [8, 128], strides = [1, 1]} : vector<8x512xf32> to vector<8x128xf32>
    %104 = arith.negf %103 : vector<8x128xf32>
    %105 = math.exp %104 : vector<8x128xf32>
    %cst_27 = arith.constant 1.000000e+00 : f32
    %106 = vector.broadcast %cst_27 : f32 to vector<8x128xf32>
    %107 = arith.addf %106, %105 : vector<8x128xf32>
    %108 = arith.divf %106, %107 : vector<8x128xf32>
    %109 = vector.extract_strided_slice %102 {offsets = [0, 128], sizes = [8, 128], strides = [1, 1]} : vector<8x512xf32> to vector<8x128xf32>
    %110 = arith.negf %109 : vector<8x128xf32>
    %111 = math.exp %110 : vector<8x128xf32>
    %cst_28 = arith.constant 1.000000e+00 : f32
    %112 = vector.broadcast %cst_28 : f32 to vector<8x128xf32>
    %113 = arith.addf %112, %111 : vector<8x128xf32>
    %114 = arith.divf %112, %113 : vector<8x128xf32>
    %115 = vector.extract_strided_slice %102 {offsets = [0, 256], sizes = [8, 128], strides = [1, 1]} : vector<8x512xf32> to vector<8x128xf32>
    %116 = math.tanh %115 : vector<8x128xf32>
    %117 = vector.extract_strided_slice %102 {offsets = [0, 384], sizes = [8, 128], strides = [1, 1]} : vector<8x512xf32> to vector<8x128xf32>
    %118 = arith.negf %117 : vector<8x128xf32>
    %119 = math.exp %118 : vector<8x128xf32>
    %cst_29 = arith.constant 1.000000e+00 : f32
    %120 = vector.broadcast %cst_29 : f32 to vector<8x128xf32>
    %121 = arith.addf %120, %119 : vector<8x128xf32>
    %122 = arith.divf %120, %121 : vector<8x128xf32>
    %123 = arith.mulf %114, %97 : vector<8x128xf32>
    %124 = arith.mulf %108, %116 : vector<8x128xf32>
    %125 = arith.addf %123, %124 : vector<8x128xf32>
    %126 = math.tanh %125 : vector<8x128xf32>
    %127 = arith.mulf %122, %126 : vector<8x128xf32>
    %128 = vector.extract_strided_slice %12 {offsets = [32, 0], sizes = [8, 512], strides = [1, 1]} : vector<64x512xf32> to vector<8x512xf32>
    %cst_30 = arith.constant dense<0.000000e+00> : vector<8x512xf32>
    %129 = tpu.matmul %127, %13, %cst_30 {dimension_numbers = #tpu.dot_dimension_numbers<[1], [0], [0], [1], [0, 0, 1, 1], [], []>} : vector<8x128xf32>, vector<128x512xf32>, vector<8x512xf32> -> vector<8x512xf32>
    %130 = arith.addf %128, %129 : vector<8x512xf32>
    %131 = vector.extract_strided_slice %130 {offsets = [0, 0], sizes = [8, 128], strides = [1, 1]} : vector<8x512xf32> to vector<8x128xf32>
    %132 = arith.negf %131 : vector<8x128xf32>
    %133 = math.exp %132 : vector<8x128xf32>
    %cst_31 = arith.constant 1.000000e+00 : f32
    %134 = vector.broadcast %cst_31 : f32 to vector<8x128xf32>
    %135 = arith.addf %134, %133 : vector<8x128xf32>
    %136 = arith.divf %134, %135 : vector<8x128xf32>
    %137 = vector.extract_strided_slice %130 {offsets = [0, 128], sizes = [8, 128], strides = [1, 1]} : vector<8x512xf32> to vector<8x128xf32>
    %138 = arith.negf %137 : vector<8x128xf32>
    %139 = math.exp %138 : vector<8x128xf32>
    %cst_32 = arith.constant 1.000000e+00 : f32
    %140 = vector.broadcast %cst_32 : f32 to vector<8x128xf32>
    %141 = arith.addf %140, %139 : vector<8x128xf32>
    %142 = arith.divf %140, %141 : vector<8x128xf32>
    %143 = vector.extract_strided_slice %130 {offsets = [0, 256], sizes = [8, 128], strides = [1, 1]} : vector<8x512xf32> to vector<8x128xf32>
    %144 = math.tanh %143 : vector<8x128xf32>
    %145 = vector.extract_strided_slice %130 {offsets = [0, 384], sizes = [8, 128], strides = [1, 1]} : vector<8x512xf32> to vector<8x128xf32>
    %146 = arith.negf %145 : vector<8x128xf32>
    %147 = math.exp %146 : vector<8x128xf32>
    %cst_33 = arith.constant 1.000000e+00 : f32
    %148 = vector.broadcast %cst_33 : f32 to vector<8x128xf32>
    %149 = arith.addf %148, %147 : vector<8x128xf32>
    %150 = arith.divf %148, %149 : vector<8x128xf32>
    %151 = arith.mulf %142, %125 : vector<8x128xf32>
    %152 = arith.mulf %136, %144 : vector<8x128xf32>
    %153 = arith.addf %151, %152 : vector<8x128xf32>
    %154 = math.tanh %153 : vector<8x128xf32>
    %155 = arith.mulf %150, %154 : vector<8x128xf32>
    %156 = vector.extract_strided_slice %12 {offsets = [40, 0], sizes = [8, 512], strides = [1, 1]} : vector<64x512xf32> to vector<8x512xf32>
    %cst_34 = arith.constant dense<0.000000e+00> : vector<8x512xf32>
    %157 = tpu.matmul %155, %13, %cst_34 {dimension_numbers = #tpu.dot_dimension_numbers<[1], [0], [0], [1], [0, 0, 1, 1], [], []>} : vector<8x128xf32>, vector<128x512xf32>, vector<8x512xf32> -> vector<8x512xf32>
    %158 = arith.addf %156, %157 : vector<8x512xf32>
    %159 = vector.extract_strided_slice %158 {offsets = [0, 0], sizes = [8, 128], strides = [1, 1]} : vector<8x512xf32> to vector<8x128xf32>
    %160 = arith.negf %159 : vector<8x128xf32>
    %161 = math.exp %160 : vector<8x128xf32>
    %cst_35 = arith.constant 1.000000e+00 : f32
    %162 = vector.broadcast %cst_35 : f32 to vector<8x128xf32>
    %163 = arith.addf %162, %161 : vector<8x128xf32>
    %164 = arith.divf %162, %163 : vector<8x128xf32>
    %165 = vector.extract_strided_slice %158 {offsets = [0, 128], sizes = [8, 128], strides = [1, 1]} : vector<8x512xf32> to vector<8x128xf32>
    %166 = arith.negf %165 : vector<8x128xf32>
    %167 = math.exp %166 : vector<8x128xf32>
    %cst_36 = arith.constant 1.000000e+00 : f32
    %168 = vector.broadcast %cst_36 : f32 to vector<8x128xf32>
    %169 = arith.addf %168, %167 : vector<8x128xf32>
    %170 = arith.divf %168, %169 : vector<8x128xf32>
    %171 = vector.extract_strided_slice %158 {offsets = [0, 256], sizes = [8, 128], strides = [1, 1]} : vector<8x512xf32> to vector<8x128xf32>
    %172 = math.tanh %171 : vector<8x128xf32>
    %173 = vector.extract_strided_slice %158 {offsets = [0, 384], sizes = [8, 128], strides = [1, 1]} : vector<8x512xf32> to vector<8x128xf32>
    %174 = arith.negf %173 : vector<8x128xf32>
    %175 = math.exp %174 : vector<8x128xf32>
    %cst_37 = arith.constant 1.000000e+00 : f32
    %176 = vector.broadcast %cst_37 : f32 to vector<8x128xf32>
    %177 = arith.addf %176, %175 : vector<8x128xf32>
    %178 = arith.divf %176, %177 : vector<8x128xf32>
    %179 = arith.mulf %170, %153 : vector<8x128xf32>
    %180 = arith.mulf %164, %172 : vector<8x128xf32>
    %181 = arith.addf %179, %180 : vector<8x128xf32>
    %182 = math.tanh %181 : vector<8x128xf32>
    %183 = arith.mulf %178, %182 : vector<8x128xf32>
    %184 = vector.extract_strided_slice %12 {offsets = [48, 0], sizes = [8, 512], strides = [1, 1]} : vector<64x512xf32> to vector<8x512xf32>
    %cst_38 = arith.constant dense<0.000000e+00> : vector<8x512xf32>
    %185 = tpu.matmul %183, %13, %cst_38 {dimension_numbers = #tpu.dot_dimension_numbers<[1], [0], [0], [1], [0, 0, 1, 1], [], []>} : vector<8x128xf32>, vector<128x512xf32>, vector<8x512xf32> -> vector<8x512xf32>
    %186 = arith.addf %184, %185 : vector<8x512xf32>
    %187 = vector.extract_strided_slice %186 {offsets = [0, 0], sizes = [8, 128], strides = [1, 1]} : vector<8x512xf32> to vector<8x128xf32>
    %188 = arith.negf %187 : vector<8x128xf32>
    %189 = math.exp %188 : vector<8x128xf32>
    %cst_39 = arith.constant 1.000000e+00 : f32
    %190 = vector.broadcast %cst_39 : f32 to vector<8x128xf32>
    %191 = arith.addf %190, %189 : vector<8x128xf32>
    %192 = arith.divf %190, %191 : vector<8x128xf32>
    %193 = vector.extract_strided_slice %186 {offsets = [0, 128], sizes = [8, 128], strides = [1, 1]} : vector<8x512xf32> to vector<8x128xf32>
    %194 = arith.negf %193 : vector<8x128xf32>
    %195 = math.exp %194 : vector<8x128xf32>
    %cst_40 = arith.constant 1.000000e+00 : f32
    %196 = vector.broadcast %cst_40 : f32 to vector<8x128xf32>
    %197 = arith.addf %196, %195 : vector<8x128xf32>
    %198 = arith.divf %196, %197 : vector<8x128xf32>
    %199 = vector.extract_strided_slice %186 {offsets = [0, 256], sizes = [8, 128], strides = [1, 1]} : vector<8x512xf32> to vector<8x128xf32>
    %200 = math.tanh %199 : vector<8x128xf32>
    %201 = vector.extract_strided_slice %186 {offsets = [0, 384], sizes = [8, 128], strides = [1, 1]} : vector<8x512xf32> to vector<8x128xf32>
    %202 = arith.negf %201 : vector<8x128xf32>
    %203 = math.exp %202 : vector<8x128xf32>
    %cst_41 = arith.constant 1.000000e+00 : f32
    %204 = vector.broadcast %cst_41 : f32 to vector<8x128xf32>
    %205 = arith.addf %204, %203 : vector<8x128xf32>
    %206 = arith.divf %204, %205 : vector<8x128xf32>
    %207 = arith.mulf %198, %181 : vector<8x128xf32>
    %208 = arith.mulf %192, %200 : vector<8x128xf32>
    %209 = arith.addf %207, %208 : vector<8x128xf32>
    %210 = math.tanh %209 : vector<8x128xf32>
    %211 = arith.mulf %206, %210 : vector<8x128xf32>
    %212 = vector.extract_strided_slice %12 {offsets = [56, 0], sizes = [8, 512], strides = [1, 1]} : vector<64x512xf32> to vector<8x512xf32>
    %cst_42 = arith.constant dense<0.000000e+00> : vector<8x512xf32>
    %213 = tpu.matmul %211, %13, %cst_42 {dimension_numbers = #tpu.dot_dimension_numbers<[1], [0], [0], [1], [0, 0, 1, 1], [], []>} : vector<8x128xf32>, vector<128x512xf32>, vector<8x512xf32> -> vector<8x512xf32>
    %214 = arith.addf %212, %213 : vector<8x512xf32>
    %215 = vector.extract_strided_slice %214 {offsets = [0, 0], sizes = [8, 128], strides = [1, 1]} : vector<8x512xf32> to vector<8x128xf32>
    %216 = arith.negf %215 : vector<8x128xf32>
    %217 = math.exp %216 : vector<8x128xf32>
    %cst_43 = arith.constant 1.000000e+00 : f32
    %218 = vector.broadcast %cst_43 : f32 to vector<8x128xf32>
    %219 = arith.addf %218, %217 : vector<8x128xf32>
    %220 = arith.divf %218, %219 : vector<8x128xf32>
    %221 = vector.extract_strided_slice %214 {offsets = [0, 128], sizes = [8, 128], strides = [1, 1]} : vector<8x512xf32> to vector<8x128xf32>
    %222 = arith.negf %221 : vector<8x128xf32>
    %223 = math.exp %222 : vector<8x128xf32>
    %cst_44 = arith.constant 1.000000e+00 : f32
    %224 = vector.broadcast %cst_44 : f32 to vector<8x128xf32>
    %225 = arith.addf %224, %223 : vector<8x128xf32>
    %226 = arith.divf %224, %225 : vector<8x128xf32>
    %227 = vector.extract_strided_slice %214 {offsets = [0, 256], sizes = [8, 128], strides = [1, 1]} : vector<8x512xf32> to vector<8x128xf32>
    %228 = math.tanh %227 : vector<8x128xf32>
    %229 = vector.extract_strided_slice %214 {offsets = [0, 384], sizes = [8, 128], strides = [1, 1]} : vector<8x512xf32> to vector<8x128xf32>
    %230 = arith.negf %229 : vector<8x128xf32>
    %231 = math.exp %230 : vector<8x128xf32>
    %cst_45 = arith.constant 1.000000e+00 : f32
    %232 = vector.broadcast %cst_45 : f32 to vector<8x128xf32>
    %233 = arith.addf %232, %231 : vector<8x128xf32>
    %234 = arith.divf %232, %233 : vector<8x128xf32>
    %235 = arith.mulf %226, %209 : vector<8x128xf32>
    %236 = arith.mulf %220, %228 : vector<8x128xf32>
    %237 = arith.addf %235, %236 : vector<8x128xf32>
    %238 = math.tanh %237 : vector<8x128xf32>
    %239 = arith.mulf %234, %238 : vector<8x128xf32>
    %c0_46 = arith.constant 0 : index
    %c0_47 = arith.constant 0 : index
    %240 = vector.load %arg12[%c0_46, %c0_47] : memref<8x128xf32, #tpu.memory_space<vmem>>, vector<8x128xf32>
    tpu.vector_store %arg12[%c0_46, %c0_47], %239 {strides = array<i32>} : memref<8x128xf32, #tpu.memory_space<vmem>>, vector<8x128xf32>,
    %c0_48 = arith.constant 0 : index
    %c0_49 = arith.constant 0 : index
    %241 = vector.load %arg13[%c0_48, %c0_49] : memref<8x128xf32, #tpu.memory_space<vmem>>, vector<8x128xf32>
    tpu.vector_store %arg13[%c0_48, %c0_49], %237 {strides = array<i32>} : memref<8x128xf32, #tpu.memory_space<vmem>>, vector<8x128xf32>,
    %242 = tpu.concatenate %43, %71, %99, %127, %155, %183, %211, %239 in 0 : vector<8x128xf32>, vector<8x128xf32>, vector<8x128xf32>, vector<8x128xf32>, vector<8x128xf32>, vector<8x128xf32>, vector<8x128xf32>, vector<8x128xf32> -> vector<64x128xf32>
    %c0_50 = arith.constant 0 : index
    %c0_51 = arith.constant 0 : index
    %243 = vector.load %arg5[%c0_50, %c0_51] : memref<128x128xf32, #tpu.memory_space<vmem>>, vector<128x128xf32>
    %cst_52 = arith.constant dense<0.000000e+00> : vector<64x128xf32>
    %244 = tpu.matmul %242, %243, %cst_52 {dimension_numbers = #tpu.dot_dimension_numbers<[1], [0], [0], [1], [0, 0, 1, 1], [], []>} : vector<64x128xf32>, vector<128x128xf32>, vector<64x128xf32> -> vector<64x128xf32>
    %c0_53 = arith.constant 0 : index
    %c0_54 = arith.constant 0 : index
    %245 = vector.load %arg6[%c0_53, %c0_54] : memref<1x128xf32, #tpu.memory_space<vmem>>, vector<1x128xf32>
    %246 = vector.broadcast %245 : vector<1x128xf32> to vector<64x128xf32>
    %247 = arith.addf %244, %246 : vector<64x128xf32>
    %cst_55 = arith.constant 0.000000e+00 : f32
    %248 = vector.broadcast %cst_55 : f32 to vector<64x128xf32>
    %249 = arith.maximumf %247, %248 : vector<64x128xf32>
    %c0_56 = arith.constant 0 : index
    %c0_57 = arith.constant 0 : index
    %250 = vector.load %arg7[%c0_56, %c0_57] : memref<128x128xf32, #tpu.memory_space<vmem>>, vector<128x128xf32>
    %cst_58 = arith.constant dense<0.000000e+00> : vector<64x128xf32>
    %251 = tpu.matmul %249, %250, %cst_58 {dimension_numbers = #tpu.dot_dimension_numbers<[1], [0], [0], [1], [0, 0, 1, 1], [], []>} : vector<64x128xf32>, vector<128x128xf32>, vector<64x128xf32> -> vector<64x128xf32>
    %c0_59 = arith.constant 0 : index
    %c0_60 = arith.constant 0 : index
    %252 = vector.load %arg8[%c0_59, %c0_60] : memref<1x128xf32, #tpu.memory_space<vmem>>, vector<1x128xf32>
    %253 = vector.broadcast %252 : vector<1x128xf32> to vector<64x128xf32>
    %254 = arith.addf %251, %253 : vector<64x128xf32>
    %c0_61 = arith.constant 0 : index
    %c0_62 = arith.constant 0 : index
    %255 = vector.load %arg11[%c0_61, %c0_62] : memref<64x128xf32, #tpu.memory_space<vmem>>, vector<64x128xf32>
    tpu.vector_store %arg11[%c0_61, %c0_62], %254 {strides = array<i32>} : memref<64x128xf32, #tpu.memory_space<vmem>>, vector<64x128xf32>,
    return
  }
}

</mosaic_0001>

<bundles_post_ra>
// kernel: tpu_custom_call.1
= control target key start
LH: loop header
LB: loop body
LE: loop exit
PB: predicated region body
PF: predicated region fallthrough
CT: control target
= control target key end

     0   :  { %19 = vsyncpa [#allocation3], 0  ;;  %s4389_s0 = inlined_call_operand.vmem [shape: s32[64,1], index: 0, kind: input, shape index: {}]   ;;  %s4390_s1 = inlined_call_operand.hbm [shape: f32[128,128], index: 1, kind: input, shape index: {}]   ;;  %s4391_s2 = inlined_call_operand.hbm [shape: f32[128,512], index: 2, kind: input, shape index: {}]   ;;  %s4392_s3 = inlined_call_operand.hbm [shape: f32[128,512], index: 3, kind: input, shape index: {}]   ;;  %s4393_s4 = inlined_call_operand.vmem [shape: f32[1,512], index: 4, kind: input, shape index: {}]   ;;  %s4394_s5 = inlined_call_operand.hbm [shape: f32[128,128], index: 5, kind: input, shape index: {}]   ;;  %s4395_s6 = inlined_call_operand.vmem [shape: f32[1,128], index: 6, kind: input, shape index: {}]   ;;  %s4396_s7 = inlined_call_operand.hbm [shape: f32[128,128], index: 7, kind: input, shape index: {}]   ;;  %s4397_s8 = inlined_call_operand.vmem [shape: f32[1,128], index: 8, kind: input, shape index: {}]   ;;  %s4398_s9 = inlined_call_operand.vmem [shape: f32[8,128], index: 9, kind: input, shape index: {}]   ;;  %s4399_s10 = inlined_call_operand.vmem [shape: f32[8,128], index: 10, kind: input, shape index: {}]   ;;  %s4400_s11 = inlined_call_operand.hbm [shape: f32[64,128], index: 11, kind: output, shape index: {0}]   ;;  %s4401_s12 = inlined_call_operand.hbm [shape: f32[8,128], index: 12, kind: output, shape index: {1}]   ;;  %s4402_s13 = inlined_call_operand.hbm [shape: f32[8,128], index: 13, kind: output, shape index: {2}]  }
   0x1   :  { %20 = vsyncpa [#allocation6], 0 }
   0x2   :  { %21 = vsyncpa [#allocation9], 0 }
   0x3   :  { %22 = vsyncpa [#allocation4], 0 }
   0x4   :  { %23 = vsyncpa [#allocation13], 0  ;;  %s3677_s25 = smov [#allocation5]   ;;  %s3491_s29 = scalar_lea.hbm %s4391_s2, 8192 }
   0x5   :  { %s43_s26 = sshll.u32 %s3677_s25, 4  ;;  %p3492_p0 = scmp.ne.s32.totalorder %s4391_s2, %s3491_s29  ;;  %s44_s26 = int_to_ptr.vmem [resolvable:$true] %s43_s26 }
   0x6   :  { %p3495_p1 = scmp.lt.u32.totalorder %s3491_s29, %s4391_s2 }
   0x8   :  { %p3497_p2 = pnand %p3495_p1, %p3492_p0 }
   0xa   :  { %3500 = shalt.err (!%p3497_p2)
}
   0xb   :  { %s3501_s17 = scalar_lea.vmem %s44_s26, 8192  ;;  %p3506_p4 = scmp.lt.s32.totalorder %s44_s26, %s44_s26 }
   0xc   :  { %p3502_p3 = scmp.ne.s32.totalorder %s44_s26, %s3501_s17  ;;  %p3507_p5 = scmp.lt.s32.totalorder %s3501_s17, %s3501_s17 }
   0xe   :  { %p3508_p6 = por %p3507_p5, %p3506_p4 }
  0x10   :  { %p3509_p7 = pnand %p3508_p6, %p3502_p3 }
  0x12   :  { %3512 = shalt.err (!%p3509_p7)
}
  0x13   :  { %s3678_s18 = smov 512   ;;  %s3679_s19 = smov 32  }
  0x14   :  { %49 = dma.hbm_to_vmem [thread:$0]  %s4391_s2, 8192, %s44_s26, [#allocation6], %s3678_s18, %s3678_s18, %s3679_s19  }
  0x15   :  { %s3680_s22 = smov [#allocation8]   ;;  %s3681_s24 = smov [#allocation2]  }
  0x16   :  { %s69_s23 = sshll.u32 %s3680_s22, 4  ;;  %s31_s25 = sshll.u32 %s3681_s24, 4  ;;  %s70_s23 = int_to_ptr.vmem [resolvable:$true] %s69_s23  ;;  %s32_s25 = int_to_ptr.vmem [resolvable:$true] %s31_s25 }
  0x17   :  { %s3513_s29 = scalar_lea.hbm %s4394_s5, 2048 }
  0x18   :  { %p3514_p8 = scmp.ne.s32.totalorder %s4394_s5, %s3513_s29  ;;  %p3517_p9 = scmp.lt.u32.totalorder %s3513_s29, %s4394_s5 }
  0x1a   :  { %p3519_p10 = pnand %p3517_p9, %p3514_p8 }
  0x1c   :  { %3522 = shalt.err (!%p3519_p10)
}
  0x1d   :  { %s3523_s2 = scalar_lea.vmem %s70_s23, 2048  ;;  %p3528_p12 = scmp.lt.s32.totalorder %s70_s23, %s70_s23 }
  0x1e   :  { %p3524_p11 = scmp.ne.s32.totalorder %s70_s23, %s3523_s2  ;;  %p3529_p13 = scmp.lt.s32.totalorder %s3523_s2, %s3523_s2 }
  0x20   :  { %p3530_p0 = por %p3529_p13, %p3528_p12 }
  0x22   :  { %p3531_p1 = pnand %p3530_p0, %p3524_p11 }
  0x24   :  { %3534 = shalt.err (!%p3531_p1)
}
  0x25   :  { %s3682_s26 = smov 128   ;;  %s3683_s17 = smov 8  }
  0x26   :  { %75 = dma.hbm_to_vmem [thread:$0]  %s4394_s5, 2048, %s70_s23, [#allocation9], %s3682_s26, %s3682_s26, %s3683_s17  }
  0x27   :  { %s3535_s27 = scalar_lea.hbm %s4390_s1, 2048 }
  0x28   :  { %p3536_p2 = scmp.ne.s32.totalorder %s4390_s1, %s3535_s27  ;;  %p3539_p3 = scmp.lt.u32.totalorder %s3535_s27, %s4390_s1 }
  0x2a   :  { %p3541_p4 = pnand %p3539_p3, %p3536_p2 }
  0x2c   :  { %3544 = shalt.err (!%p3541_p4)
}
  0x2d   :  { %s3545_s15 = scalar_lea.vmem %s32_s25, 2048  ;;  %p3550_p6 = scmp.lt.s32.totalorder %s32_s25, %s32_s25 }
  0x2e   :  { %p3546_p5 = scmp.ne.s32.totalorder %s32_s25, %s3545_s15  ;;  %p3551_p7 = scmp.lt.s32.totalorder %s3545_s15, %s3545_s15 }
  0x30   :  { %p3552_p8 = por %p3551_p7, %p3550_p6 }
  0x32   :  { %p3553_p9 = pnand %p3552_p8, %p3546_p5 }
  0x34   :  { %3556 = shalt.err (!%p3553_p9)
}
  0x35   :  { %37 = dma.hbm_to_vmem [thread:$0]  %s4390_s1, 2048, %s32_s25, [#allocation3], %s3682_s26, %s3682_s26, %s3683_s17  }
  0x36   :  { %s3684_s16 = smov [#allocation7]   ;;  %s3685_s20 = smov [#allocation10]  }
  0x37   :  { %s55_s2 = sshll.u32 %s3684_s16, 4  ;;  %s83_s21 = sshll.u32 %s3685_s20, 4  ;;  %s56_s2 = int_to_ptr.vmem [resolvable:$true] %s55_s2  ;;  %s84_s21 = int_to_ptr.vmem [resolvable:$true] %s83_s21 }
  0x38   :  { %s3557_s27 = scalar_lea.hbm %s4392_s3, 8192 }
  0x39   :  { %p3558_p10 = scmp.ne.s32.totalorder %s4392_s3, %s3557_s27  ;;  %p3561_p11 = scmp.lt.u32.totalorder %s3557_s27, %s4392_s3 }
  0x3b   :  { %p3563_p12 = pnand %p3561_p11, %p3558_p10 }
  0x3d   :  { %3566 = shalt.err (!%p3563_p12)
}
  0x3e   :  { %s3567_s1 = scalar_lea.vmem %s56_s2, 8192  ;;  %p3572_p0 = scmp.lt.s32.totalorder %s56_s2, %s56_s2 }
  0x3f   :  { %p3568_p13 = scmp.ne.s32.totalorder %s56_s2, %s3567_s1  ;;  %p3573_p1 = scmp.lt.s32.totalorder %s3567_s1, %s3567_s1 }
  0x41   :  { %p3574_p2 = por %p3573_p1, %p3572_p0 }
  0x43   :  { %p3575_p3 = pnand %p3574_p2, %p3568_p13 }
  0x45   :  { %3578 = shalt.err (!%p3575_p3)
}
  0x46   :  { %61 = dma.hbm_to_vmem [thread:$0]  %s4392_s3, 8192, %s56_s2, [#allocation6], %s3678_s18, %s3678_s18, %s3679_s19  }
  0x47   :  { %s3579_s16 = scalar_lea.hbm %s4396_s7, 2048 }
  0x48   :  { %p3580_p4 = scmp.ne.s32.totalorder %s4396_s7, %s3579_s16  ;;  %p3583_p5 = scmp.lt.u32.totalorder %s3579_s16, %s4396_s7 }
  0x4a   :  { %p3585_p6 = pnand %p3583_p5, %p3580_p4 }
  0x4c   :  { %3588 = shalt.err (!%p3585_p6)
}
  0x4d   :  { %s3589_s28 = scalar_lea.vmem %s84_s21, 2048  ;;  %p3594_p8 = scmp.lt.s32.totalorder %s84_s21, %s84_s21 }
  0x4e   :  { %p3590_p7 = scmp.ne.s32.totalorder %s84_s21, %s3589_s28  ;;  %p3595_p9 = scmp.lt.s32.totalorder %s3589_s28, %s3589_s28 }
  0x50   :  { %p3596_p10 = por %p3595_p9, %p3594_p8 }
  0x52   :  { %p3597_p11 = pnand %p3596_p10, %p3590_p7 }
  0x54   :  { %3600 = shalt.err (!%p3597_p11)
}
  0x55   :  { %89 = dma.hbm_to_vmem [thread:$0]  %s4396_s7, 2048, %s84_s21, [#allocation9], %s3682_s26, %s3682_s26, %s3683_s17  }
  0x56   :  { %3667 = dma.done.wait [#allocation3], 2048  }
  0x57   :  { %3668 = vsyncadd [#allocation3], 4294965248 }
  0x58   :  { %3669 = dma.done.wait [#allocation6], 16384  }
  0x59   :  { %3670 = vsyncadd [#allocation6], 4294950912 }
  0x5a   :  { %3671 = dma.done.wait [#allocation9], 4096  }
  0x5b   :  { %3672 = vsyncadd [#allocation9], 4294963200  ;;  %v3686_v0 = vmov 0   ;;  %v113_v1 = vld [vmem:[%s4389_s0 + $0x10] sm:$0xff]  ;;  %v111_v2 = vld [vmem:[%s4389_s0] sm:$0xff] }
  0x5c   :  { %3362 = vset.pattern.permute.xlu1 %v3686_v0  ;;  %3361 = vset.pattern.permute.xlu0 %v3686_v0  ;;  %v114_v3 = vld [vmem:[%s4389_s0 + $0x18] sm:$0xff]  ;;  %v112_v4 = vld [vmem:[%s4389_s0 + $0x8] sm:$0xff]  ;;  %v170_v6 = vld [vmem:[#allocation2 + $0x8] sm:$0xff] }
  0x5d   :  { %128 = vperm.xlu1 %3362, %v113_v1   ;;  %122 = vperm.xlu0 %3361, %v111_v2   ;;  %v169_v5 = vld [vmem:[#allocation2] sm:$0xff]  ;;  %v171_v7 = vld [vmem:[#allocation2 + $0x10] sm:$0xff]  ;;  %v172_v8 = vld [vmem:[#allocation2 + $0x18] sm:$0xff] }
  0x5e   :  { %v2594_v9 = vpack.c.bf16 %v170_v6, %v169_v5  ;;  %v2598_v10 = vpack.c.bf16 %v172_v8, %v171_v7  ;;  %v173_v11 = vld [vmem:[#allocation2 + $0x20] sm:$0xff]  ;;  %v174_v12 = vld [vmem:[#allocation2 + $0x28] sm:$0xff]  ;;  %v116_v13 = vld [vmem:[%s4389_s0 + $0x28] sm:$0xff] }
  0x5f   :  { %v115_v14 = vld [vmem:[%s4389_s0 + $0x20] sm:$0xff]  ;;  %v2602_v15 = vpack.c.bf16 %v174_v12, %v173_v11  ;;  %v175_v16 = vld [vmem:[#allocation2 + $0x30] sm:$0xff]  ;;  %v176_v17 = vld [vmem:[#allocation2 + $0x38] sm:$0xff] }
  0x60   :  { %2595 = vmatprep.subr.bf16.mxu0 %v2594_v9  ;;  %v118_v18 = vld [vmem:[%s4389_s0 + $0x38] sm:$0xff]  ;;  %v117_v19 = vld [vmem:[%s4389_s0 + $0x30] sm:$0xff]  ;;  %v2606_v20 = vpack.c.bf16 %v176_v17, %v175_v16  ;;  %v178_v22 = vld [vmem:[#allocation2 + $0x48] sm:$0xff] }
  0x61   :  { %131 = vperm.xlu1 %3362, %v114_v3   ;;  %125 = vperm.xlu0 %3361, %v112_v4   ;;  %v177_v21 = vld [vmem:[#allocation2 + $0x40] sm:$0xff]  ;;  %v179_v24 = vld [vmem:[#allocation2 + $0x50] sm:$0xff]  ;;  %v180_v25 = vld [vmem:[#allocation2 + $0x58] sm:$0xff] }
  0x62   :  { %2597 = vmatpush3.bf16.msra.mxu0 %v2594_v9  ;;  %v2610_v23 = vpack.c.bf16 %v178_v22, %v177_v21  ;;  %v291_v26 = vld [vmem:[#allocation5 + $0x8] sm:$0xff]  ;;  %v290_v28 = vld [vmem:[#allocation5] sm:$0xff]  ;;  %v2614_v31 = vpack.c.bf16 %v180_v25, %v179_v24  ;;  %v183_v47 = vld [vmem:[#allocation2 + $0x70] sm:$0xff] }
  0x63   :  { %2599 = vmatprep.subr.bf16.mxu0 %v2598_v10  ;;  %v295_v27 = vld [vmem:[#allocation5 + $0x28] sm:$0xff]  ;;  %v294_v30 = vld [vmem:[#allocation5 + $0x20] sm:$0xff]  ;;  %v184_v48 = vld [vmem:[#allocation2 + $0x78] sm:$0xff] }
  0x64   :  { %v2626_v29 = vpack.c.bf16 %v295_v27, %v291_v26  ;;  %v181_v32 = vld [vmem:[#allocation2 + $0x60] sm:$0xff]  ;;  %v182_v33 = vld [vmem:[#allocation2 + $0x68] sm:$0xff]  ;;  %v2628_v34 = vpack.c.bf16 %v294_v30, %v290_v28  ;;  %v2622_v55 = vpack.c.bf16 %v184_v48, %v183_v47  ;;  %v293_v57 = vld [vmem:[#allocation5 + $0x18] sm:$0xff]  ;;  %v3687_v28 = vmov 1.0  }
  0x65   :  { %137 = vperm.xlu1 %3362, %v116_v13   ;;  %134 = vperm.xlu0 %3361, %v115_v14   ;;  %v299_v35 = vld [vmem:[#allocation5 + $0x48] sm:$0xff]  ;;  %v298_v37 = vld [vmem:[#allocation5 + $0x40] sm:$0xff]  ;;  %v2618_v43 = vpack.c.bf16 %v182_v33, %v181_v32  ;;  %v297_v58 = vld [vmem:[#allocation5 + $0x38] sm:$0xff] }
  0x66   :  { %2601 = vmatpush3.bf16.msra.mxu0 %v2598_v10  ;;  %2627 = vmatprep.subr.bf16.mxu1 %v2626_v29  ;;  %v303_v36 = vld [vmem:[#allocation5 + $0x68] sm:$0xff]  ;;  %v302_v38 = vld [vmem:[#allocation5 + $0x60] sm:$0xff]  ;;  %v2658_v0 = vpack.c.bf16 %v297_v58, %v293_v57  ;;  %v292_v24 = vld [vmem:[#allocation5 + $0x10] sm:$0xff] }
  0x67   :  { %2603 = vmatprep.subr.bf16.mxu0 %v2602_v15  ;;  %2629 = vmatpush1.bf16.msra.mxu1 %v2628_v34  ;;  %v2630_v39 = vpack.c.bf16 %v303_v36, %v299_v35  ;;  %v2632_v40 = vpack.c.bf16 %v302_v38, %v298_v37  ;;  %v307_v41 = vld [vmem:[#allocation5 + $0x88] sm:$0xff]  ;;  %v306_v45 = vld [vmem:[#allocation5 + $0x80] sm:$0xff]  ;;  %v296_v25 = vld [vmem:[#allocation5 + $0x30] sm:$0xff] }
  0x68   :  { %v311_v42 = vld [vmem:[#allocation5 + $0xa8] sm:$0xff]  ;;  %v310_v46 = vld [vmem:[#allocation5 + $0xa0] sm:$0xff]  ;;  %v301_v26 = vld [vmem:[#allocation5 + $0x58] sm:$0xff]  ;;  %v2660_v29 = vpack.c.bf16 %v296_v25, %v292_v24 }
  0x69   :  { %143 = vperm.xlu1 %3362, %v118_v18   ;;  %140 = vperm.xlu0 %3361, %v117_v19   ;;  %v2634_v44 = vpack.c.bf16 %v311_v42, %v307_v41  ;;  %v2636_v49 = vpack.c.bf16 %v310_v46, %v306_v45  ;;  %v315_v50 = vld [vmem:[#allocation5 + $0xc8] sm:$0xff]  ;;  %v314_v53 = vld [vmem:[#allocation5 + $0xc0] sm:$0xff]  ;;  %v305_v27 = vld [vmem:[#allocation5 + $0x78] sm:$0xff] }
  0x6a   :  { %2605 = vmatpush3.bf16.msra.mxu0 %v2602_v15  ;;  %2631 = vmatprep.subr.bf16.mxu1 %v2630_v39  ;;  %v319_v51 = vld [vmem:[#allocation5 + $0xe8] sm:$0xff]  ;;  %v318_v54 = vld [vmem:[#allocation5 + $0xe0] sm:$0xff]  ;;  %v2662_v32 = vpack.c.bf16 %v305_v27, %v301_v26  ;;  %v300_v33 = vld [vmem:[#allocation5 + $0x50] sm:$0xff] }
  0x6b   :  { %2607 = vmatprep.subr.bf16.mxu0 %v2606_v20  ;;  %2633 = vmatpush1.bf16.msra.mxu1 %v2632_v40  ;;  %v2638_v52 = vpack.c.bf16 %v319_v51, %v315_v50  ;;  %v323_v56 = vld [vmem:[#allocation5 + $0x108] sm:$0xff]  ;;  %v2640_v60 = vpack.c.bf16 %v318_v54, %v314_v53  ;;  %v322_v62 = vld [vmem:[#allocation5 + $0x100] sm:$0xff]  ;;  %v304_v34 = vld [vmem:[#allocation5 + $0x70] sm:$0xff] }
  0x6c   :  { %2635 = vmatprep.subr.bf16.mxu1 %v2634_v44  ;;  %v327_v59 = vld [vmem:[#allocation5 + $0x128] sm:$0xff]  ;;  %v326_v63 = vld [vmem:[#allocation5 + $0x120] sm:$0xff]  ;;  %v309_v35 = vld [vmem:[#allocation5 + $0x98] sm:$0xff]  ;;  %v2664_v37 = vpack.c.bf16 %v304_v34, %v300_v33 }
  0x6d   :  { %v2642_v61 = vpack.c.bf16 %v327_v59, %v323_v56  ;;  %v331_v1 = vld [vmem:[#allocation5 + $0x148] sm:$0xff]  ;;  %v2644_v3 = vpack.c.bf16 %v326_v63, %v322_v62  ;;  %v330_v5 = vld [vmem:[#allocation5 + $0x140] sm:$0xff]  ;;  %v313_v36 = vld [vmem:[#allocation5 + $0xb8] sm:$0xff] }
  0x6e   :  { %2609 = vmatpush3.bf16.msra.mxu0 %v2606_v20  ;;  %v335_v2 = vld [vmem:[#allocation5 + $0x168] sm:$0xff]  ;;  %v334_v6 = vld [vmem:[#allocation5 + $0x160] sm:$0xff]  ;;  %v119_v20 = vlaneseq  ;;  %v2666_v40 = vpack.c.bf16 %v313_v36, %v309_v35  ;;  %v308_v41 = vld [vmem:[#allocation5 + $0x90] sm:$0xff] }
  0x6f   :  { %2611 = vmatprep.subr.bf16.mxu0 %v2610_v23  ;;  %2637 = vmatpush1.bf16.msra.mxu1 %v2636_v49  ;;  %v2646_v4 = vpack.c.bf16 %v335_v2, %v331_v1  ;;  %v339_v7 = vld [vmem:[#allocation5 + $0x188] sm:$0xff]  ;;  %v2648_v9 = vpack.c.bf16 %v334_v6, %v330_v5  ;;  %v338_v11 = vld [vmem:[#allocation5 + $0x180] sm:$0xff]  ;;  %v312_v42 = vld [vmem:[#allocation5 + $0xb0] sm:$0xff] }
  0x70   :  { %2639 = vmatprep.subr.bf16.mxu1 %v2638_v52  ;;  %v343_v8 = vld [vmem:[#allocation5 + $0x1a8] sm:$0xff]  ;;  %v342_v12 = vld [vmem:[#allocation5 + $0x1a0] sm:$0xff]  ;;  %v120_v21 = vand.u32 127, %v119_v20  ;;  %v321_v44 = vld [vmem:[#allocation5 + $0xf8] sm:$0xff]  ;;  %v2668_v45 = vpack.c.bf16 %v312_v42, %v308_v41 }
  0x71   :  { %v2650_v10 = vpack.c.bf16 %v343_v8, %v339_v7  ;;  %v347_v13 = vld [vmem:[#allocation5 + $0x1c8] sm:$0xff]  ;;  %v2652_v15 = vpack.c.bf16 %v342_v12, %v338_v11  ;;  %v346_v17 = vld [vmem:[#allocation5 + $0x1c0] sm:$0xff]  ;;  %v316_v48 = vld [vmem:[#allocation5 + $0xd0] sm:$0xff] }
  0x72   :  { %2613 = vmatpush3.bf16.msra.mxu0 %v2610_v23  ;;  %v351_v14 = vld [vmem:[#allocation5 + $0x1e8] sm:$0xff]  ;;  %v350_v18 = vld [vmem:[#allocation5 + $0x1e0] sm:$0xff]  ;;  %v320_v49 = vld [vmem:[#allocation5 + $0xf0] sm:$0xff] }
  0x73   :  { %2615 = vmatprep.subr.bf16.mxu0 %v2614_v31  ;;  %2641 = vmatpush1.bf16.msra.mxu1 %v2640_v60  ;;  %v2654_v16 = vpack.c.bf16 %v351_v14, %v347_v13  ;;  %v2656_v19 = vpack.c.bf16 %v350_v18, %v346_v17  ;;  %v325_v50 = vld [vmem:[#allocation5 + $0x118] sm:$0xff]  ;;  %v2672_v53 = vpack.c.bf16 %v320_v49, %v316_v48  ;;  %v328_v56 = vld [vmem:[#allocation5 + $0x130] sm:$0xff]  ;;  %v603_v12 = vld [vmem:[#allocation7 + $0x8] sm:$0xff]  ;;  %v3688_v17 = vmov 0.0  }
  0x74   :  { %2643 = vmatprep.subr.bf16.mxu1 %v2642_v61  ;;  %v329_v51 = vld [vmem:[#allocation5 + $0x138] sm:$0xff]  ;;  %v332_v61 = vld [vmem:[#allocation5 + $0x150] sm:$0xff]  ;;  %v607_v13 = vld [vmem:[#allocation7 + $0x28] sm:$0xff]  ;;  %440 = vmatprep.mubr.f32.mxu1 %v3688_v17 }
  0x75   :  { %v2674_v54 = vpack.c.bf16 %v329_v51, %v325_v50  ;;  %v333_v57 = vld [vmem:[#allocation5 + $0x158] sm:$0xff]  ;;  %v336_v62 = vld [vmem:[#allocation5 + $0x170] sm:$0xff]  ;;  %v611_v24 = vld [vmem:[#allocation7 + $0x48] sm:$0xff] }
  0x76   :  { %2617 = vmatpush3.bf16.msra.mxu0 %v2614_v31  ;;  %v337_v58 = vld [vmem:[#allocation5 + $0x178] sm:$0xff]  ;;  %v2680_v1 = vpack.c.bf16 %v336_v62, %v332_v61  ;;  %v615_v25 = vld [vmem:[#allocation7 + $0x68] sm:$0xff]  ;;  %v612_v33 = vld [vmem:[#allocation7 + $0x50] sm:$0xff] }
  0x77   :  { %2619 = vmatprep.subr.bf16.mxu0 %v2618_v43  ;;  %2645 = vmatpush1.bf16.msra.mxu1 %v2644_v3  ;;  %v2678_v60 = vpack.c.bf16 %v337_v58, %v333_v57  ;;  %v341_v63 = vld [vmem:[#allocation5 + $0x198] sm:$0xff]  ;;  %v340_v3 = vld [vmem:[#allocation5 + $0x190] sm:$0xff]  ;;  %v3874_v36 = vpack.c.bf16 %v615_v25, %v611_v24  ;;  %v626_v58 = vld [vmem:[#allocation7 + $0xc0] sm:$0xff] }
  0x78   :  { %2647 = vmatprep.subr.bf16.mxu1 %v2646_v4  ;;  %v344_v4 = vld [vmem:[#allocation5 + $0x1b0] sm:$0xff]  ;;  %v349_v5 = vld [vmem:[#allocation5 + $0x1d8] sm:$0xff] }
  0x79   :  { %v353_v6 = vld [vmem:[#allocation5 + $0x1f8] sm:$0xff]  ;;  %v2684_v7 = vpack.c.bf16 %v344_v4, %v340_v3  ;;  %v616_v34 = vld [vmem:[#allocation7 + $0x70] sm:$0xff]  ;;  %v639_v3 = vld [vmem:[#allocation7 + $0x128] sm:$0xff] }
  0x7a   :  { %2621 = vmatpush3.bf16.msra.mxu0 %v2618_v43  ;;  %v317_v43 = vld [vmem:[#allocation5 + $0xd8] sm:$0xff]  ;;  %v2686_v8 = vpack.c.bf16 %v353_v6, %v349_v5  ;;  %v624_v48 = vld [vmem:[#allocation7 + $0xb0] sm:$0xff] }
  0x7b   :  { %2623 = vmatprep.subr.bf16.mxu0 %v2622_v55  ;;  %2649 = vmatpush1.bf16.msra.mxu1 %v2648_v9  ;;  %v2670_v47 = vpack.c.bf16 %v321_v44, %v317_v43  ;;  %v348_v9 = vld [vmem:[#allocation5 + $0x1d0] sm:$0xff]  ;;  %v605_v14 = vld [vmem:[#allocation7 + $0x18] sm:$0xff]  ;;  %v3882_v43 = vpack.c.bf16 %v616_v34, %v612_v33  ;;  %v618_v44 = vld [vmem:[#allocation7 + $0x80] sm:$0xff] }
  0x7c   :  { %2651 = vmatprep.subr.bf16.mxu1 %v2650_v10  ;;  %v352_v10 = vld [vmem:[#allocation5 + $0x1f0] sm:$0xff]  ;;  %v613_v26 = vld [vmem:[#allocation7 + $0x58] sm:$0xff]  ;;  %v651_v34 = vld [vmem:[#allocation7 + $0x188] sm:$0xff] }
  0x7d   :  { %v2688_v11 = vpack.c.bf16 %v352_v10, %v348_v9  ;;  %v617_v27 = vld [vmem:[#allocation7 + $0x78] sm:$0xff]  ;;  %v628_v61 = vld [vmem:[#allocation7 + $0xd0] sm:$0xff]  ;;  %v638_v10 = vld [vmem:[#allocation7 + $0x120] sm:$0xff] }
  0x7e   :  { %2625 = vmatpush3.bf16.msra.mxu0 %v2622_v55  ;;  %v324_v55 = vld [vmem:[#allocation5 + $0x110] sm:$0xff]  ;;  %v625_v41 = vld [vmem:[#allocation7 + $0xb8] sm:$0xff] }
  0x7f   :  { %2659 = vmatprep.subr.bf16.mxu0 %v2658_v0  ;;  %2653 = vmatpush1.bf16.msra.mxu1 %v2652_v15  ;;  %v2676_v59 = vpack.c.bf16 %v328_v56, %v324_v55  ;;  %v345_v0 = vld [vmem:[#allocation5 + $0x1b8] sm:$0xff]  ;;  %v3862_v15 = vpack.c.bf16 %v607_v13, %v603_v12  ;;  %v632_v62 = vld [vmem:[#allocation7 + $0xf0] sm:$0xff] }
  0x80   :  { %2655 = vmatprep.subr.bf16.mxu1 %v2654_v16  ;;  %v2682_v2 = vpack.c.bf16 %v345_v0, %v341_v63  ;;  %v609_v16 = vld [vmem:[#allocation7 + $0x38] sm:$0xff]  ;;  %v640_v12 = vld [vmem:[#allocation7 + $0x130] sm:$0xff] }
  0x81   :  { %v3866_v18 = vpack.c.bf16 %v609_v16, %v605_v14  ;;  %v633_v55 = vld [vmem:[#allocation7 + $0xf8] sm:$0xff] }
  0x82   :  { %v637_v4 = vld [vmem:[#allocation7 + $0x118] sm:$0xff] }
  0x83   :  { %2657 = vmatpush1.bf16.msra.mxu1 %v2656_v19  ;;  %v602_v19 = vld [vmem:[#allocation7] sm:$0xff]  ;;  %v641_v5 = vld [vmem:[#allocation7 + $0x138] sm:$0xff] }
  0x84   :  { %2691 = vmatprep.subr.bf16.mxu1 %v3862_v15  ;;  %v3924_v16 = vpack.c.bf16 %v641_v5, %v637_v4 }
  0xdc   :  { %v129_v22 = vpop.permute.xlu1 %128  ;;  %v123_v23 = vpop.permute.xlu0 %122 }
  0xdd   :  { %vm145_vm0 = vcmp.eq.s32.totalorder %v120_v21, %v123_v23  ;;  %vm147_vm1 = vcmp.eq.s32.totalorder %v120_v21, %v129_v22  ;;  %v604_v22 = vld [vmem:[#allocation7 + $0x10] sm:$0xff] }
  0xde   :  { %2494 = vmatprep.mubr.msk.f32.mxu0 %vm145_vm0, %v3687_v28  ;;  %v608_v23 = vld [vmem:[#allocation7 + $0x30] sm:$0xff] }
  0xe0   :  { %v132_v30 = vpop.permute.xlu1 %131  ;;  %v126_v31 = vpop.permute.xlu0 %125 }
  0xe1   :  { %vm146_vm2 = vcmp.eq.s32.totalorder %v120_v21, %v126_v31  ;;  %vm148_vm3 = vcmp.eq.s32.totalorder %v120_v21, %v132_v30  ;;  %v610_v30 = vld [vmem:[#allocation7 + $0x40] sm:$0xff] }
  0xe2   :  { %2495 = vmatmul.mubr.msk.f32.vlgmr.msra.gmra.mrb[0].mxu0 %vm146_vm2, %v3687_v28 }
  0xe3   :  { %2497 = vmatprep.mubr.msk.f32.mxu0 %vm147_vm1, %v3687_v28  ;;  %2661 = vmatpush1.bf16.msra.mxu0 %v2660_v29  ;;  %v3872_v29 = vpack.c.bf16 %v608_v23, %v604_v22  ;;  %v645_v22 = vld [vmem:[#allocation7 + $0x158] sm:$0xff] }
  0xe4   :  { %v138_v38 = vpop.permute.xlu1 %137  ;;  %v135_v39 = vpop.permute.xlu0 %134  ;;  %2663 = vmatprep.subr.bf16.mxu0 %v2662_v32  ;;  %v614_v32 = vld [vmem:[#allocation7 + $0x60] sm:$0xff]  ;;  %v649_v23 = vld [vmem:[#allocation7 + $0x178] sm:$0xff] }
  0xe5   :  { %vm149_vm4 = vcmp.eq.s32.totalorder %v120_v21, %v135_v39  ;;  %vm150_vm5 = vcmp.eq.s32.totalorder %v120_v21, %v138_v38  ;;  %v619_v38 = vld [vmem:[#allocation7 + $0x88] sm:$0xff]  ;;  %v3880_v42 = vpack.c.bf16 %v614_v32, %v610_v30  ;;  %v644_v30 = vld [vmem:[#allocation7 + $0x150] sm:$0xff]  ;;  %v3938_v33 = vpack.c.bf16 %v649_v23, %v645_v22 }
  0xe6   :  { %2498 = vmatmul.mubr.msk.f32.gmra.mrb[2].mxu0 %vm148_vm3, %v3687_v28  ;;  %v623_v39 = vld [vmem:[#allocation7 + $0xa8] sm:$0xff] }
  0xe7   :  { %2500 = vmatprep.mubr.msk.f32.mxu0 %vm149_vm4, %v3687_v28  ;;  %2665 = vmatpush1.bf16.msra.mxu0 %v2664_v37  ;;  %v3876_v37 = vpack.c.bf16 %v617_v27, %v613_v26  ;;  %v3888_v50 = vpack.c.bf16 %v623_v39, %v619_v38  ;;  %v642_v26 = vld [vmem:[#allocation7 + $0x140] sm:$0xff]  ;;  %v653_v38 = vld [vmem:[#allocation7 + $0x198] sm:$0xff] }
  0xe8   :  { %v141_v46 = vpop.permute.xlu0 %140  ;;  %2667 = vmatprep.subr.bf16.mxu0 %v2666_v40  ;;  %v144_v52 = vpop.permute.xlu1 %143  ;;  %v621_v40 = vld [vmem:[#allocation7 + $0x98] sm:$0xff]  ;;  %v646_v27 = vld [vmem:[#allocation7 + $0x160] sm:$0xff] }
  0xe9   :  { %vm151_vm6 = vcmp.eq.s32.totalorder %v120_v21, %v141_v46  ;;  %vm152_vm7 = vcmp.eq.s32.totalorder %v120_v21, %v144_v52  ;;  %v606_v21 = vld [vmem:[#allocation7 + $0x20] sm:$0xff]  ;;  %v3890_v51 = vpack.c.bf16 %v625_v41, %v621_v40  ;;  %v627_v52 = vld [vmem:[#allocation7 + $0xc8] sm:$0xff]  ;;  %v657_v39 = vld [vmem:[#allocation7 + $0x1b8] sm:$0xff]  ;;  %v3942_v40 = vpack.c.bf16 %v646_v27, %v642_v26 }
  0xea   :  { %2501 = vmatmul.mubr.msk.f32.gmra.mrb[4].mxu0 %vm150_vm5, %v3687_v28  ;;  %v622_v46 = vld [vmem:[#allocation7 + $0xa0] sm:$0xff] }
  0xeb   :  { %2503 = vmatprep.mubr.msk.f32.mxu0 %vm151_vm6, %v3687_v28  ;;  %2669 = vmatpush1.bf16.msra.mxu0 %v2668_v45  ;;  %v3894_v56 = vpack.c.bf16 %v622_v46, %v618_v44  ;;  %v650_v44 = vld [vmem:[#allocation7 + $0x180] sm:$0xff]  ;;  %v652_v46 = vld [vmem:[#allocation7 + $0x190] sm:$0xff] }
  0xec   :  { %2671 = vmatprep.subr.bf16.mxu0 %v2670_v47  ;;  %v620_v47 = vld [vmem:[#allocation7 + $0x90] sm:$0xff] }
  0xed   :  { %v3896_v57 = vpack.c.bf16 %v624_v48, %v620_v47  ;;  %v656_v47 = vld [vmem:[#allocation7 + $0x1b0] sm:$0xff] }
  0xee   :  { %2504 = vmatmul.mubr.msk.f32.gmra.mrb[6].mxu0 %vm152_vm7, %v3687_v28  ;;  %v3870_v28 = vpack.c.bf16 %v606_v21, %v602_v19  ;;  %v643_v19 = vld [vmem:[#allocation7 + $0x148] sm:$0xff] }
  0xef   :  { %2673 = vmatpush1.bf16.msra.mxu0 %v2672_v53  ;;  %553 = vmatprep.mubr.f32.mxu0 %v3688_v17  ;;  %v631_v53 = vld [vmem:[#allocation7 + $0xe8] sm:$0xff] }
  0xf0   :  { %2675 = vmatprep.subr.bf16.mxu0 %v2674_v54  ;;  %v629_v54 = vld [vmem:[#allocation7 + $0xd8] sm:$0xff]  ;;  %v3904_v0 = vpack.c.bf16 %v631_v53, %v627_v52  ;;  %v647_v21 = vld [vmem:[#allocation7 + $0x168] sm:$0xff] }
  0xf1   :  { %v3936_v32 = vpack.c.bf16 %v647_v21, %v643_v19  ;;  %v659_v52 = vld [vmem:[#allocation7 + $0x1c8] sm:$0xff] }
  0xf2   :  { %v663_v53 = vld [vmem:[#allocation7 + $0x1e8] sm:$0xff] }
  0xf3   :  { %2677 = vmatpush1.bf16.msra.mxu0 %v2676_v59 }
  0xf4   :  { %2679 = vmatprep.subr.bf16.mxu0 %v2678_v60  ;;  %v630_v60 = vld [vmem:[#allocation7 + $0xe0] sm:$0xff] }
  0xf5   :  { %v3910_v6 = vpack.c.bf16 %v630_v60, %v626_v58  ;;  %v3960_v60 = vpack.c.bf16 %v656_v47, %v652_v46 }
  0xf7   :  { %2681 = vmatpush1.bf16.msra.mxu0 %v2680_v1  ;;  %v3906_v1 = vpack.c.bf16 %v633_v55, %v629_v54  ;;  %v661_v54 = vld [vmem:[#allocation7 + $0x1d8] sm:$0xff] }
  0xf8   :  { %2683 = vmatprep.subr.bf16.mxu0 %v2682_v2  ;;  %v635_v2 = vld [vmem:[#allocation7 + $0x108] sm:$0xff]  ;;  %v665_v55 = vld [vmem:[#allocation7 + $0x1f8] sm:$0xff] }
  0xf9   :  { %v3922_v14 = vpack.c.bf16 %v639_v3, %v635_v2  ;;  %v664_v2 = vld [vmem:[#allocation7 + $0x1f0] sm:$0xff]  ;;  %v3968_v3 = vpack.c.bf16 %v665_v55, %v661_v54 }
  0xfb   :  { %2685 = vmatpush1.bf16.msra.mxu0 %v2684_v7  ;;  %v3912_v7 = vpack.c.bf16 %v632_v62, %v628_v61  ;;  %v658_v61 = vld [vmem:[#allocation7 + $0x1c0] sm:$0xff] }
  0xfc   :  { %2687 = vmatprep.subr.bf16.mxu0 %v2686_v8  ;;  %v634_v8 = vld [vmem:[#allocation7 + $0x100] sm:$0xff] }
  0xfd   :  { %v3928_v24 = vpack.c.bf16 %v638_v10, %v634_v8  ;;  %v662_v62 = vld [vmem:[#allocation7 + $0x1e0] sm:$0xff]  ;;  %v666_v8 = vld [vmem:[%s4398_s9] sm:$0xff] }
  0xfe   :  { %v3974_v4 = vpack.c.bf16 %v662_v62, %v658_v61  ;;  %v667_v62 = vld [vmem:[%s4399_s10] sm:$0xff] }
  0xff   :  { %2689 = vmatpush1.bf16.msra.mxu0 %v2688_v11  ;;  %v636_v11 = vld [vmem:[#allocation7 + $0x110] sm:$0xff] }
 0x100   :  { %2723 = vmatprep.subr.bf16.mxu0 %v3866_v18  ;;  %v3930_v25 = vpack.c.bf16 %v640_v12, %v636_v11  ;;  %v354_v11 = vld [vmem:[%s4393_s4] sm:$0xf] }
 0x1b5   :  { %v2496_v31 = vpop.f32.mrb[0].mxu0 }
 0x1b6   :  { %v251_v35 = vpop.f32.mrb[1].mxu0 }
 0x1b7   :  { %441 = vmatmul.mubr.f32.vlgmr.msra.gmra.mrb[0].mxu1 %v251_v35  ;;  %554 = vmatmul.mubr.f32.vlgmr.msra.gmra.mrb[8].mxu0 %v251_v35  ;;  %v655_v35 = vld [vmem:[#allocation7 + $0x1a8] sm:$0xff] }
 0x1b8   :  { %2693 = vmatpush1.bf16.msra.mxu1 %v3870_v28  ;;  %2725 = vmatpush1.bf16.msra.mxu0 %v3872_v29  ;;  %v3950_v48 = vpack.c.bf16 %v655_v35, %v651_v34 }
 0x1b9   :  { %v2499_v45 = vpop.f32.mrb[2].mxu0  ;;  %446 = vmatprep.mubr.f32.mxu1 %v3688_v17  ;;  %559 = vmatprep.mubr.f32.mxu0 %v3688_v17 }
 0x1ba   :  { %v261_v49 = vpop.f32.mrb[3].mxu0  ;;  %2695 = vmatprep.subr.bf16.mxu1 %v3874_v36  ;;  %2727 = vmatprep.subr.bf16.mxu0 %v3876_v37 }
 0x1bb   :  { %447 = vmatmul.mubr.f32.gmra.mrb[2].mxu1 %v2496_v31  ;;  %560 = vmatmul.mubr.f32.gmra.mrb[10].mxu0 %v2496_v31  ;;  %v648_v31 = vld [vmem:[#allocation7 + $0x170] sm:$0xff] }
 0x1bc   :  { %2697 = vmatpush1.bf16.msra.mxu1 %v3880_v42  ;;  %2729 = vmatpush1.bf16.msra.mxu0 %v3882_v43  ;;  %v3944_v41 = vpack.c.bf16 %v648_v31, %v644_v30 }
 0x1bd   :  { %v3898_v59 = vpop.f32.mrb[4].mxu0  ;;  %452 = vmatprep.mubr.f32.mxu1 %v3688_v17  ;;  %565 = vmatprep.mubr.f32.mxu0 %v3688_v17 }
 0x1be   :  { %v271_v63 = vpop.f32.mrb[5].mxu0  ;;  %2699 = vmatprep.subr.bf16.mxu1 %v3888_v50  ;;  %2731 = vmatprep.subr.bf16.mxu0 %v3890_v51 }
 0x1bf   :  { %453 = vmatmul.mubr.f32.gmra.mrb[4].mxu1 %v261_v49  ;;  %566 = vmatmul.mubr.f32.gmra.mrb[12].mxu0 %v261_v49  ;;  %v3952_v49 = vpack.c.bf16 %v657_v39, %v653_v38 }
 0x1c0   :  { %2701 = vmatpush1.bf16.msra.mxu1 %v3894_v56  ;;  %2733 = vmatpush1.bf16.msra.mxu0 %v3896_v57 }
 0x1c1   :  { %v3914_v9 = vpop.f32.mrb[6].mxu0  ;;  %458 = vmatprep.mubr.f32.mxu1 %v3688_v17  ;;  %571 = vmatprep.mubr.f32.mxu0 %v3688_v17 }
 0x1c2   :  { %v3918_v13 = vpop.f32.mrb[7].mxu0  ;;  %2703 = vmatprep.subr.bf16.mxu1 %v3904_v0  ;;  %2735 = vmatprep.subr.bf16.mxu0 %v3906_v1 }
 0x1c3   :  { %459 = vmatmul.mubr.f32.gmra.mrb[6].mxu1 %v2499_v45  ;;  %572 = vmatmul.mubr.f32.gmra.mrb[14].mxu0 %v2499_v45  ;;  %v654_v45 = vld [vmem:[#allocation7 + $0x1a0] sm:$0xff] }
 0x1c4   :  { %2705 = vmatpush1.bf16.msra.mxu1 %v3910_v6  ;;  %2737 = vmatpush1.bf16.msra.mxu0 %v3912_v7  ;;  %v3958_v58 = vpack.c.bf16 %v654_v45, %v650_v44 }
 0x1c5   :  { %464 = vmatprep.mubr.f32.mxu1 %v3688_v17  ;;  %577 = vmatprep.mubr.f32.mxu0 %v3688_v17 }
 0x1c6   :  { %2707 = vmatprep.subr.bf16.mxu1 %v3922_v14  ;;  %2739 = vmatprep.subr.bf16.mxu0 %v3924_v16 }
 0x1c7   :  { %465 = vmatmul.mubr.f32.gmra.mrb[8].mxu1 %v271_v63  ;;  %578 = vmatmul.mubr.f32.gmra.mrb[16].mxu0 %v271_v63  ;;  %v660_v63 = vld [vmem:[#allocation7 + $0x1d0] sm:$0xff] }
 0x1c8   :  { %2709 = vmatpush1.bf16.msra.mxu1 %v3928_v24  ;;  %2741 = vmatpush1.bf16.msra.mxu0 %v3930_v25  ;;  %v3976_v5 = vpack.c.bf16 %v664_v2, %v660_v63 }
 0x1c9   :  { %470 = vmatprep.mubr.f32.mxu1 %v3688_v17  ;;  %583 = vmatprep.mubr.f32.mxu0 %v3688_v17 }
 0x1ca   :  { %2711 = vmatprep.subr.bf16.mxu1 %v3936_v32  ;;  %2743 = vmatprep.subr.bf16.mxu0 %v3938_v33 }
 0x1cb   :  { %471 = vmatmul.mubr.f32.gmra.mrb[10].mxu1 %v3898_v59  ;;  %584 = vmatmul.mubr.f32.gmra.mrb[18].mxu0 %v3898_v59  ;;  %v3966_v59 = vpack.c.bf16 %v663_v53, %v659_v52 }
 0x1cc   :  { %2713 = vmatpush1.bf16.msra.mxu1 %v3942_v40  ;;  %2745 = vmatpush1.bf16.msra.mxu0 %v3944_v41 }
 0x1cd   :  { %476 = vmatprep.mubr.f32.mxu1 %v3688_v17  ;;  %589 = vmatprep.mubr.f32.mxu0 %v3688_v17 }
 0x1ce   :  { %2715 = vmatprep.subr.bf16.mxu1 %v3950_v48  ;;  %2747 = vmatprep.subr.bf16.mxu0 %v3952_v49 }
 0x1cf   :  { %477 = vmatmul.mubr.f32.gmra.mrb[12].mxu1 %v3918_v13  ;;  %590 = vmatmul.mubr.f32.gmra.mrb[20].mxu0 %v3918_v13 }
 0x1d0   :  { %2717 = vmatpush1.bf16.msra.mxu1 %v3958_v58  ;;  %2749 = vmatpush1.bf16.msra.mxu0 %v3960_v60 }
 0x1d1   :  { %482 = vmatprep.mubr.f32.mxu1 %v3688_v17  ;;  %595 = vmatprep.mubr.f32.mxu0 %v3688_v17 }
 0x1d2   :  { %2719 = vmatprep.subr.bf16.mxu1 %v3966_v59  ;;  %2751 = vmatprep.subr.bf16.mxu0 %v3968_v3 }
 0x1d3   :  { %483 = vmatmul.mubr.f32.gmra.mrb[14].mxu1 %v3914_v9  ;;  %596 = vmatmul.mubr.f32.gmra.mrb[22].mxu0 %v3914_v9  ;;  %v357_v9 = vshrl.u32 %v119_v20, 7 }
 0x1d4   :  { %2721 = vmatpush1.bf16.msra.mxu1 %v3974_v4  ;;  %2753 = vmatpush1.bf16.msra.mxu0 %v3976_v5 }
 0x1d5   :  { %732 = vmatprep.mubr.f32.mxu1 %v3688_v17  ;;  %803 = vmatprep.mubr.f32.mxu0 %v3688_v17  ;;  %v358_v10 = vsub.s32 0, %v357_v9  ;;  %v362_v12 = vsub.s32 1, %v357_v9  ;;  %v370_v23 = vsub.s32 3, %v357_v9  ;;  %v366_v38 = vsub.s32 2, %v357_v9 }
 0x1d6   :  { %2755 = vmatprep.subr.bf16.mxu1 %v3862_v15  ;;  %2787 = vmatprep.subr.bf16.mxu0 %v3866_v18 }
 0x1d7   :  { %733 = vmatmul.mubr.f32.vlgmr.msra.gmra.mrb[0].mxu1 %v666_v8  ;;  %804 = vmatmul.mubr.f32.vlgmr.msra.gmra.mrb[8].mxu0 %v666_v8  ;;  %v4031_v13 = vrot.slane %v354_v11, %v358_v10  ;;  %v4033_v19 = vrot.slane %v354_v11, %v362_v12  ;;  %v4037_v35 = vrot.slane %v354_v11, %v370_v23 }
 0x1d8   :  { %2757 = vmatpush1.bf16.msra.mxu1 %v3870_v28  ;;  %2789 = vmatpush1.bf16.msra.mxu0 %v3872_v29  ;;  %v4040_v44 = vrot.slane %v354_v11, %v366_v38 }
 0x1d9   :  { %2759 = vmatprep.subr.bf16.mxu1 %v3874_v36  ;;  %2791 = vmatprep.subr.bf16.mxu0 %v3876_v37 }
 0x1da   :  { %902 = vmatprep.mubr.f32.mxu1 %v3688_v17  ;;  %973 = vmatprep.mubr.f32.mxu0 %v3688_v17 }
 0x1dc   :  { %2761 = vmatpush1.bf16.msra.mxu1 %v3880_v42  ;;  %2793 = vmatpush1.bf16.msra.mxu0 %v3882_v43 }
 0x1dd   :  { %2763 = vmatprep.subr.bf16.mxu1 %v3888_v50  ;;  %2795 = vmatprep.subr.bf16.mxu0 %v3890_v51 }
 0x1e0   :  { %2765 = vmatpush1.bf16.msra.mxu1 %v3894_v56  ;;  %2797 = vmatpush1.bf16.msra.mxu0 %v3896_v57 }
 0x1e1   :  { %2767 = vmatprep.subr.bf16.mxu1 %v3904_v0  ;;  %2799 = vmatprep.subr.bf16.mxu0 %v3906_v1 }
 0x1e4   :  { %2769 = vmatpush1.bf16.msra.mxu1 %v3910_v6  ;;  %2801 = vmatpush1.bf16.msra.mxu0 %v3912_v7 }
 0x1e5   :  { %2771 = vmatprep.subr.bf16.mxu1 %v3922_v14  ;;  %2803 = vmatprep.subr.bf16.mxu0 %v3924_v16 }
 0x1e8   :  { %2773 = vmatpush1.bf16.msra.mxu1 %v3928_v24  ;;  %2805 = vmatpush1.bf16.msra.mxu0 %v3930_v25 }
 0x1e9   :  { %2775 = vmatprep.subr.bf16.mxu1 %v3936_v32  ;;  %2807 = vmatprep.subr.bf16.mxu0 %v3938_v33 }
 0x1ec   :  { %2777 = vmatpush1.bf16.msra.mxu1 %v3942_v40  ;;  %2809 = vmatpush1.bf16.msra.mxu0 %v3944_v41 }
 0x1ed   :  { %2779 = vmatprep.subr.bf16.mxu1 %v3950_v48  ;;  %2811 = vmatprep.subr.bf16.mxu0 %v3952_v49 }
 0x1f0   :  { %2781 = vmatpush1.bf16.msra.mxu1 %v3958_v58  ;;  %2813 = vmatpush1.bf16.msra.mxu0 %v3960_v60 }
 0x1f1   :  { %2783 = vmatprep.subr.bf16.mxu1 %v3966_v59  ;;  %2815 = vmatprep.subr.bf16.mxu0 %v3968_v3 }
 0x1f4   :  { %2785 = vmatpush1.bf16.msra.mxu1 %v3974_v4  ;;  %2817 = vmatpush1.bf16.msra.mxu0 %v3976_v5 }
 0x1f5   :  { %2819 = vmatprep.subr.bf16.mxu1 %v3862_v15  ;;  %2851 = vmatprep.subr.bf16.mxu0 %v3866_v18 }
 0x2aa   :  { %v734_v21 = vpop.f32.mrb[0].mxu1  ;;  %v805_v22 = vpop.f32.mrb[8].mxu0 }
 0x2ab   :  { %v3282_v26 = vadd.f32 %v734_v21, %v4031_v13  ;;  %v736_v27 = vpop.f32.mrb[1].mxu1  ;;  %v807_v30 = vpop.f32.mrb[9].mxu0  ;;  %v3298_v46 = vadd.f32 %v805_v22, %v4040_v44 }
 0x2ac   :  { %v3283_v31 = vadd.f32 %v736_v27, %v4033_v19  ;;  %v3299_v39 = vadd.f32 %v807_v30, %v4037_v35 }
 0x2ad   :  { %v2364_v20 = vmul.f32 -1.442695, %v3282_v26 }
 0x2ae   :  { %v2365_v34 = vmul.f32 -1.442695, %v3283_v31  ;;  %v2366_v45 = vmul.f32 -1.442695, %v3299_v39 }
 0x2af   :  { %3363 = vpow2.f32 %v2364_v20 }
 0x2b0   :  { %3365 = vpow2.f32 %v2365_v34 }
 0x2b1   :  { %3367 = vpow2.f32 %v2366_v45 }
 0x2b2   :  { %3369 = vtanh.f32 %v3298_v46 }
 0x2b9   :  { %v3364_v47 = vpop.eup %3363 }
 0x2ba   :  { %v3366_v52 = vpop.eup %3365  ;;  %v817_v53 = vadd.f32 1.0, %v3364_v47 }
 0x2bb   :  { %v823_v54 = vadd.f32 1.0, %v3366_v52  ;;  %v3368_v55 = vpop.eup %3367 }
 0x2bc   :  { %3371 = vrcp.f32 %v817_v53  ;;  %v3370_v61 = vpop.eup %3369  ;;  %v830_v9 = vadd.f32 1.0, %v3368_v55 }
 0x2bd   :  { %3373 = vrcp.f32 %v823_v54 }
 0x2be   :  { %3375 = vrcp.f32 %v830_v9 }
 0x2c6   :  { %v3372_v63 = vpop.eup %3371 }
 0x2c7   :  { %v3374_v2 = vpop.eup %3373  ;;  %v834_v8 = vmul.f32 %v3372_v63, %v3370_v61 }
 0x2c8   :  { %v833_v10 = vmul.f32 %v3374_v2, %v667_v62  ;;  %v3376_v12 = vpop.eup %3375 }
 0x2ca   :  { %v4046_v11 = vadd.f32 %v834_v8, %v833_v10 }
 0x2cc   :  { %3377 = vtanh.f32 %v4046_v11 }
 0x2d6   :  { %v3378_v21 = vpop.eup %3377 }
 0x2d7   :  { %v4049_v22 = vmul.f32 %v3378_v21, %v3376_v12 }
 0x2d9   :  { %903 = vmatmul.mubr.f32.vlgmr.msra.gmra.mrb[2].mxu1 %v4049_v22  ;;  %974 = vmatmul.mubr.f32.vlgmr.msra.gmra.mrb[10].mxu0 %v4049_v22 }
 0x2da   :  { %2821 = vmatpush1.bf16.msra.mxu1 %v3870_v28  ;;  %2853 = vmatpush1.bf16.msra.mxu0 %v3872_v29 }
 0x2db   :  { %2823 = vmatprep.subr.bf16.mxu1 %v3874_v36  ;;  %2855 = vmatprep.subr.bf16.mxu0 %v3876_v37 }
 0x2dc   :  { %1072 = vmatprep.mubr.f32.mxu1 %v3688_v17  ;;  %1143 = vmatprep.mubr.f32.mxu0 %v3688_v17 }
 0x2de   :  { %2825 = vmatpush1.bf16.msra.mxu1 %v3880_v42  ;;  %2857 = vmatpush1.bf16.msra.mxu0 %v3882_v43 }
 0x2df   :  { %2827 = vmatprep.subr.bf16.mxu1 %v3888_v50  ;;  %2859 = vmatprep.subr.bf16.mxu0 %v3890_v51 }
 0x2e2   :  { %2829 = vmatpush1.bf16.msra.mxu1 %v3894_v56  ;;  %2861 = vmatpush1.bf16.msra.mxu0 %v3896_v57 }
 0x2e3   :  { %2831 = vmatprep.subr.bf16.mxu1 %v3904_v0  ;;  %2863 = vmatprep.subr.bf16.mxu0 %v3906_v1 }
 0x2e6   :  { %2833 = vmatpush1.bf16.msra.mxu1 %v3910_v6  ;;  %2865 = vmatpush1.bf16.msra.mxu0 %v3912_v7 }
 0x2e7   :  { %2835 = vmatprep.subr.bf16.mxu1 %v3922_v14  ;;  %2867 = vmatprep.subr.bf16.mxu0 %v3924_v16 }
 0x2ea   :  { %2837 = vmatpush1.bf16.msra.mxu1 %v3928_v24  ;;  %2869 = vmatpush1.bf16.msra.mxu0 %v3930_v25 }
 0x2eb   :  { %2839 = vmatprep.subr.bf16.mxu1 %v3936_v32  ;;  %2871 = vmatprep.subr.bf16.mxu0 %v3938_v33 }
 0x2ee   :  { %2841 = vmatpush1.bf16.msra.mxu1 %v3942_v40  ;;  %2873 = vmatpush1.bf16.msra.mxu0 %v3944_v41 }
 0x2ef   :  { %2843 = vmatprep.subr.bf16.mxu1 %v3950_v48  ;;  %2875 = vmatprep.subr.bf16.mxu0 %v3952_v49 }
 0x2f2   :  { %2845 = vmatpush1.bf16.msra.mxu1 %v3958_v58  ;;  %2877 = vmatpush1.bf16.msra.mxu0 %v3960_v60 }
 0x2f3   :  { %2847 = vmatprep.subr.bf16.mxu1 %v3966_v59  ;;  %2879 = vmatprep.subr.bf16.mxu0 %v3968_v3 }
 0x2f6   :  { %2849 = vmatpush1.bf16.msra.mxu1 %v3974_v4  ;;  %2881 = vmatpush1.bf16.msra.mxu0 %v3976_v5 }
 0x2f7   :  { %2883 = vmatprep.subr.bf16.mxu1 %v3862_v15  ;;  %2915 = vmatprep.subr.bf16.mxu0 %v3866_v18 }
 0x3ac   :  { %v904_v23 = vpop.f32.mrb[2].mxu1  ;;  %v975_v26 = vpop.f32.mrb[10].mxu0 }
 0x3ad   :  { %v3284_v27 = vadd.f32 %v904_v23, %v4031_v13  ;;  %v906_v30 = vpop.f32.mrb[3].mxu1  ;;  %v977_v31 = vpop.f32.mrb[11].mxu0  ;;  %v3300_v46 = vadd.f32 %v975_v26, %v4040_v44 }
 0x3ae   :  { %v3285_v20 = vadd.f32 %v906_v30, %v4033_v19  ;;  %v3301_v39 = vadd.f32 %v977_v31, %v4037_v35 }
 0x3af   :  { %v2367_v34 = vmul.f32 -1.442695, %v3284_v27 }
 0x3b0   :  { %v2368_v38 = vmul.f32 -1.442695, %v3285_v20  ;;  %v2369_v45 = vmul.f32 -1.442695, %v3301_v39 }
 0x3b1   :  { %3379 = vpow2.f32 %v2367_v34 }
 0x3b2   :  { %3381 = vpow2.f32 %v2368_v38 }
 0x3b3   :  { %3383 = vpow2.f32 %v2369_v45 }
 0x3b4   :  { %3385 = vtanh.f32 %v3300_v46 }
 0x3bb   :  { %v3380_v47 = vpop.eup %3379 }
 0x3bc   :  { %v3382_v52 = vpop.eup %3381  ;;  %v987_v53 = vadd.f32 1.0, %v3380_v47 }
 0x3bd   :  { %v993_v54 = vadd.f32 1.0, %v3382_v52  ;;  %v3384_v55 = vpop.eup %3383 }
 0x3be   :  { %3387 = vrcp.f32 %v987_v53  ;;  %v3386_v61 = vpop.eup %3385  ;;  %v1000_v8 = vadd.f32 1.0, %v3384_v55 }
 0x3bf   :  { %3389 = vrcp.f32 %v993_v54 }
 0x3c0   :  { %3391 = vrcp.f32 %v1000_v8 }
 0x3c8   :  { %v3388_v62 = vpop.eup %3387 }
 0x3c9   :  { %v3390_v63 = vpop.eup %3389  ;;  %v1004_v2 = vmul.f32 %v3388_v62, %v3386_v61 }
 0x3ca   :  { %v1003_v9 = vmul.f32 %v3390_v63, %v4046_v11  ;;  %v3392_v12 = vpop.eup %3391 }
 0x3cc   :  { %v4092_v10 = vadd.f32 %v1004_v2, %v1003_v9 }
 0x3ce   :  { %3393 = vtanh.f32 %v4092_v10 }
 0x3d8   :  { %v3394_v21 = vpop.eup %3393 }
 0x3d9   :  { %v4095_v23 = vmul.f32 %v3394_v21, %v3392_v12 }
 0x3db   :  { %1073 = vmatmul.mubr.f32.vlgmr.msra.gmra.mrb[4].mxu1 %v4095_v23  ;;  %1144 = vmatmul.mubr.f32.vlgmr.msra.gmra.mrb[12].mxu0 %v4095_v23 }
 0x3dc   :  { %2885 = vmatpush1.bf16.msra.mxu1 %v3870_v28  ;;  %2917 = vmatpush1.bf16.msra.mxu0 %v3872_v29 }
 0x3dd   :  { %2887 = vmatprep.subr.bf16.mxu1 %v3874_v36  ;;  %2919 = vmatprep.subr.bf16.mxu0 %v3876_v37 }
 0x3de   :  { %1242 = vmatprep.mubr.f32.mxu1 %v3688_v17  ;;  %1313 = vmatprep.mubr.f32.mxu0 %v3688_v17 }
 0x3e0   :  { %2889 = vmatpush1.bf16.msra.mxu1 %v3880_v42  ;;  %2921 = vmatpush1.bf16.msra.mxu0 %v3882_v43 }
 0x3e1   :  { %2891 = vmatprep.subr.bf16.mxu1 %v3888_v50  ;;  %2923 = vmatprep.subr.bf16.mxu0 %v3890_v51 }
 0x3e4   :  { %2893 = vmatpush1.bf16.msra.mxu1 %v3894_v56  ;;  %2925 = vmatpush1.bf16.msra.mxu0 %v3896_v57 }
 0x3e5   :  { %2895 = vmatprep.subr.bf16.mxu1 %v3904_v0  ;;  %2927 = vmatprep.subr.bf16.mxu0 %v3906_v1 }
 0x3e8   :  { %2897 = vmatpush1.bf16.msra.mxu1 %v3910_v6  ;;  %2929 = vmatpush1.bf16.msra.mxu0 %v3912_v7 }
 0x3e9   :  { %2899 = vmatprep.subr.bf16.mxu1 %v3922_v14  ;;  %2931 = vmatprep.subr.bf16.mxu0 %v3924_v16 }
 0x3ec   :  { %2901 = vmatpush1.bf16.msra.mxu1 %v3928_v24  ;;  %2933 = vmatpush1.bf16.msra.mxu0 %v3930_v25 }
 0x3ed   :  { %2903 = vmatprep.subr.bf16.mxu1 %v3936_v32  ;;  %2935 = vmatprep.subr.bf16.mxu0 %v3938_v33 }
 0x3f0   :  { %2905 = vmatpush1.bf16.msra.mxu1 %v3942_v40  ;;  %2937 = vmatpush1.bf16.msra.mxu0 %v3944_v41 }
 0x3f1   :  { %2907 = vmatprep.subr.bf16.mxu1 %v3950_v48  ;;  %2939 = vmatprep.subr.bf16.mxu0 %v3952_v49 }
 0x3f4   :  { %2909 = vmatpush1.bf16.msra.mxu1 %v3958_v58  ;;  %2941 = vmatpush1.bf16.msra.mxu0 %v3960_v60 }
 0x3f5   :  { %2911 = vmatprep.subr.bf16.mxu1 %v3966_v59  ;;  %2943 = vmatprep.subr.bf16.mxu0 %v3968_v3 }
 0x3f8   :  { %2913 = vmatpush1.bf16.msra.mxu1 %v3974_v4  ;;  %2945 = vmatpush1.bf16.msra.mxu0 %v3976_v5 }
 0x3f9   :  { %2947 = vmatprep.subr.bf16.mxu1 %v3862_v15  ;;  %2979 = vmatprep.subr.bf16.mxu0 %v3866_v18 }
 0x4ae   :  { %v1074_v11 = vpop.f32.mrb[4].mxu1  ;;  %v1145_v26 = vpop.f32.mrb[12].mxu0 }
 0x4af   :  { %v3286_v27 = vadd.f32 %v1074_v11, %v4031_v13  ;;  %v1076_v30 = vpop.f32.mrb[5].mxu1  ;;  %v1147_v31 = vpop.f32.mrb[13].mxu0  ;;  %v3302_v46 = vadd.f32 %v1145_v26, %v4040_v44 }
 0x4b0   :  { %v3287_v20 = vadd.f32 %v1076_v30, %v4033_v19  ;;  %v3303_v39 = vadd.f32 %v1147_v31, %v4037_v35 }
 0x4b1   :  { %v2370_v34 = vmul.f32 -1.442695, %v3286_v27 }
 0x4b2   :  { %v2371_v38 = vmul.f32 -1.442695, %v3287_v20  ;;  %v2372_v45 = vmul.f32 -1.442695, %v3303_v39 }
 0x4b3   :  { %3395 = vpow2.f32 %v2370_v34 }
 0x4b4   :  { %3397 = vpow2.f32 %v2371_v38 }
 0x4b5   :  { %3399 = vpow2.f32 %v2372_v45 }
 0x4b6   :  { %3401 = vtanh.f32 %v3302_v46 }
 0x4bd   :  { %v3396_v47 = vpop.eup %3395 }
 0x4be   :  { %v3398_v52 = vpop.eup %3397  ;;  %v1157_v53 = vadd.f32 1.0, %v3396_v47 }
 0x4bf   :  { %v1163_v54 = vadd.f32 1.0, %v3398_v52  ;;  %v3400_v55 = vpop.eup %3399 }
 0x4c0   :  { %3403 = vrcp.f32 %v1157_v53  ;;  %v3402_v61 = vpop.eup %3401  ;;  %v1170_v8 = vadd.f32 1.0, %v3400_v55 }
 0x4c1   :  { %3405 = vrcp.f32 %v1163_v54 }
 0x4c2   :  { %3407 = vrcp.f32 %v1170_v8 }
 0x4ca   :  { %v3404_v62 = vpop.eup %3403 }
 0x4cb   :  { %v3406_v63 = vpop.eup %3405  ;;  %v1174_v2 = vmul.f32 %v3404_v62, %v3402_v61 }
 0x4cc   :  { %v1173_v9 = vmul.f32 %v3406_v63, %v4092_v10  ;;  %v3408_v21 = vpop.eup %3407 }
 0x4ce   :  { %v4138_v12 = vadd.f32 %v1174_v2, %v1173_v9 }
 0x4d0   :  { %3409 = vtanh.f32 %v4138_v12 }
 0x4da   :  { %v3410_v11 = vpop.eup %3409 }
 0x4db   :  { %v4141_v26 = vmul.f32 %v3410_v11, %v3408_v21 }
 0x4dd   :  { %1243 = vmatmul.mubr.f32.vlgmr.msra.gmra.mrb[6].mxu1 %v4141_v26  ;;  %1314 = vmatmul.mubr.f32.vlgmr.msra.gmra.mrb[14].mxu0 %v4141_v26 }
 0x4de   :  { %2949 = vmatpush1.bf16.msra.mxu1 %v3870_v28  ;;  %2981 = vmatpush1.bf16.msra.mxu0 %v3872_v29 }
 0x4df   :  { %2951 = vmatprep.subr.bf16.mxu1 %v3874_v36  ;;  %2983 = vmatprep.subr.bf16.mxu0 %v3876_v37 }
 0x4e0   :  { %1412 = vmatprep.mubr.f32.mxu1 %v3688_v17  ;;  %1483 = vmatprep.mubr.f32.mxu0 %v3688_v17 }
 0x4e2   :  { %2953 = vmatpush1.bf16.msra.mxu1 %v3880_v42  ;;  %2985 = vmatpush1.bf16.msra.mxu0 %v3882_v43 }
 0x4e3   :  { %2955 = vmatprep.subr.bf16.mxu1 %v3888_v50  ;;  %2987 = vmatprep.subr.bf16.mxu0 %v3890_v51 }
 0x4e6   :  { %2957 = vmatpush1.bf16.msra.mxu1 %v3894_v56  ;;  %2989 = vmatpush1.bf16.msra.mxu0 %v3896_v57 }
 0x4e7   :  { %2959 = vmatprep.subr.bf16.mxu1 %v3904_v0  ;;  %2991 = vmatprep.subr.bf16.mxu0 %v3906_v1 }
 0x4ea   :  { %2961 = vmatpush1.bf16.msra.mxu1 %v3910_v6  ;;  %2993 = vmatpush1.bf16.msra.mxu0 %v3912_v7 }
 0x4eb   :  { %2963 = vmatprep.subr.bf16.mxu1 %v3922_v14  ;;  %2995 = vmatprep.subr.bf16.mxu0 %v3924_v16 }
 0x4ee   :  { %2965 = vmatpush1.bf16.msra.mxu1 %v3928_v24  ;;  %2997 = vmatpush1.bf16.msra.mxu0 %v3930_v25 }
 0x4ef   :  { %2967 = vmatprep.subr.bf16.mxu1 %v3936_v32  ;;  %2999 = vmatprep.subr.bf16.mxu0 %v3938_v33 }
 0x4f2   :  { %2969 = vmatpush1.bf16.msra.mxu1 %v3942_v40  ;;  %3001 = vmatpush1.bf16.msra.mxu0 %v3944_v41 }
 0x4f3   :  { %2971 = vmatprep.subr.bf16.mxu1 %v3950_v48  ;;  %3003 = vmatprep.subr.bf16.mxu0 %v3952_v49 }
 0x4f6   :  { %2973 = vmatpush1.bf16.msra.mxu1 %v3958_v58  ;;  %3005 = vmatpush1.bf16.msra.mxu0 %v3960_v60 }
 0x4f7   :  { %2975 = vmatprep.subr.bf16.mxu1 %v3966_v59  ;;  %3007 = vmatprep.subr.bf16.mxu0 %v3968_v3 }
 0x4fa   :  { %2977 = vmatpush1.bf16.msra.mxu1 %v3974_v4  ;;  %3009 = vmatpush1.bf16.msra.mxu0 %v3976_v5 }
 0x4fb   :  { %3011 = vmatprep.subr.bf16.mxu1 %v3862_v15  ;;  %3043 = vmatprep.subr.bf16.mxu0 %v3866_v18 }
 0x5b0   :  { %v1244_v10 = vpop.f32.mrb[6].mxu1  ;;  %v1315_v27 = vpop.f32.mrb[14].mxu0 }
 0x5b1   :  { %v3288_v30 = vadd.f32 %v1244_v10, %v4031_v13  ;;  %v1246_v31 = vpop.f32.mrb[7].mxu1  ;;  %v1317_v20 = vpop.f32.mrb[15].mxu0  ;;  %v3304_v47 = vadd.f32 %v1315_v27, %v4040_v44 }
 0x5b2   :  { %v3289_v34 = vadd.f32 %v1246_v31, %v4033_v19  ;;  %v3305_v45 = vadd.f32 %v1317_v20, %v4037_v35 }
 0x5b3   :  { %v2373_v38 = vmul.f32 -1.442695, %v3288_v30 }
 0x5b4   :  { %v2374_v39 = vmul.f32 -1.442695, %v3289_v34  ;;  %v2375_v46 = vmul.f32 -1.442695, %v3305_v45 }
 0x5b5   :  { %3411 = vpow2.f32 %v2373_v38 }
 0x5b6   :  { %3413 = vpow2.f32 %v2374_v39 }
 0x5b7   :  { %3415 = vpow2.f32 %v2375_v46 }
 0x5b8   :  { %3417 = vtanh.f32 %v3304_v47 }
 0x5bf   :  { %v3412_v52 = vpop.eup %3411 }
 0x5c0   :  { %v3414_v53 = vpop.eup %3413  ;;  %v1327_v54 = vadd.f32 1.0, %v3412_v52 }
 0x5c1   :  { %v1333_v55 = vadd.f32 1.0, %v3414_v53  ;;  %v3416_v61 = vpop.eup %3415 }
 0x5c2   :  { %3419 = vrcp.f32 %v1327_v54  ;;  %v3418_v62 = vpop.eup %3417  ;;  %v1340_v9 = vadd.f32 1.0, %v3416_v61 }
 0x5c3   :  { %3421 = vrcp.f32 %v1333_v55 }
 0x5c4   :  { %3423 = vrcp.f32 %v1340_v9 }
 0x5cc   :  { %v3420_v63 = vpop.eup %3419 }
 0x5cd   :  { %v3422_v2 = vpop.eup %3421  ;;  %v1344_v8 = vmul.f32 %v3420_v63, %v3418_v62 }
 0x5ce   :  { %v1343_v21 = vmul.f32 %v3422_v2, %v4138_v12  ;;  %v3424_v10 = vpop.eup %3423 }
 0x5d0   :  { %v4184_v11 = vadd.f32 %v1344_v8, %v1343_v21 }
 0x5d2   :  { %3425 = vtanh.f32 %v4184_v11 }
 0x5dc   :  { %v3426_v27 = vpop.eup %3425 }
 0x5dd   :  { %v4187_v30 = vmul.f32 %v3426_v27, %v3424_v10 }
 0x5df   :  { %1413 = vmatmul.mubr.f32.vlgmr.msra.gmra.mrb[8].mxu1 %v4187_v30  ;;  %1484 = vmatmul.mubr.f32.vlgmr.msra.gmra.mrb[16].mxu0 %v4187_v30 }
 0x5e0   :  { %3013 = vmatpush1.bf16.msra.mxu1 %v3870_v28  ;;  %3045 = vmatpush1.bf16.msra.mxu0 %v3872_v29 }
 0x5e1   :  { %3015 = vmatprep.subr.bf16.mxu1 %v3874_v36  ;;  %3047 = vmatprep.subr.bf16.mxu0 %v3876_v37 }
 0x5e2   :  { %1582 = vmatprep.mubr.f32.mxu1 %v3688_v17  ;;  %1653 = vmatprep.mubr.f32.mxu0 %v3688_v17 }
 0x5e4   :  { %3017 = vmatpush1.bf16.msra.mxu1 %v3880_v42  ;;  %3049 = vmatpush1.bf16.msra.mxu0 %v3882_v43 }
 0x5e5   :  { %3019 = vmatprep.subr.bf16.mxu1 %v3888_v50  ;;  %3051 = vmatprep.subr.bf16.mxu0 %v3890_v51 }
 0x5e8   :  { %3021 = vmatpush1.bf16.msra.mxu1 %v3894_v56  ;;  %3053 = vmatpush1.bf16.msra.mxu0 %v3896_v57 }
 0x5e9   :  { %3023 = vmatprep.subr.bf16.mxu1 %v3904_v0  ;;  %3055 = vmatprep.subr.bf16.mxu0 %v3906_v1 }
 0x5ec   :  { %3025 = vmatpush1.bf16.msra.mxu1 %v3910_v6  ;;  %3057 = vmatpush1.bf16.msra.mxu0 %v3912_v7 }
 0x5ed   :  { %3027 = vmatprep.subr.bf16.mxu1 %v3922_v14  ;;  %3059 = vmatprep.subr.bf16.mxu0 %v3924_v16 }
 0x5f0   :  { %3029 = vmatpush1.bf16.msra.mxu1 %v3928_v24  ;;  %3061 = vmatpush1.bf16.msra.mxu0 %v3930_v25 }
 0x5f1   :  { %3031 = vmatprep.subr.bf16.mxu1 %v3936_v32  ;;  %3063 = vmatprep.subr.bf16.mxu0 %v3938_v33 }
 0x5f4   :  { %3033 = vmatpush1.bf16.msra.mxu1 %v3942_v40  ;;  %3065 = vmatpush1.bf16.msra.mxu0 %v3944_v41 }
 0x5f5   :  { %3035 = vmatprep.subr.bf16.mxu1 %v3950_v48  ;;  %3067 = vmatprep.subr.bf16.mxu0 %v3952_v49 }
 0x5f8   :  { %3037 = vmatpush1.bf16.msra.mxu1 %v3958_v58  ;;  %3069 = vmatpush1.bf16.msra.mxu0 %v3960_v60 }
 0x5f9   :  { %3039 = vmatprep.subr.bf16.mxu1 %v3966_v59  ;;  %3071 = vmatprep.subr.bf16.mxu0 %v3968_v3 }
 0x5fc   :  { %3041 = vmatpush1.bf16.msra.mxu1 %v3974_v4  ;;  %3073 = vmatpush1.bf16.msra.mxu0 %v3976_v5 }
 0x5fd   :  { %3075 = vmatprep.subr.bf16.mxu1 %v3862_v15  ;;  %3107 = vmatprep.subr.bf16.mxu0 %v3866_v18 }
 0x6b2   :  { %v1414_v12 = vpop.f32.mrb[8].mxu1  ;;  %v1485_v31 = vpop.f32.mrb[16].mxu0 }
 0x6b3   :  { %v3290_v20 = vadd.f32 %v1414_v12, %v4031_v13  ;;  %v1416_v34 = vpop.f32.mrb[9].mxu1  ;;  %v1487_v38 = vpop.f32.mrb[17].mxu0  ;;  %v3306_v53 = vadd.f32 %v1485_v31, %v4040_v44 }
 0x6b4   :  { %v3291_v39 = vadd.f32 %v1416_v34, %v4033_v19  ;;  %v3307_v47 = vadd.f32 %v1487_v38, %v4037_v35 }
 0x6b5   :  { %v2376_v45 = vmul.f32 -1.442695, %v3290_v20 }
 0x6b6   :  { %v2377_v46 = vmul.f32 -1.442695, %v3291_v39  ;;  %v2378_v52 = vmul.f32 -1.442695, %v3307_v47 }
 0x6b7   :  { %3427 = vpow2.f32 %v2376_v45 }
 0x6b8   :  { %3429 = vpow2.f32 %v2377_v46 }
 0x6b9   :  { %3431 = vpow2.f32 %v2378_v52 }
 0x6ba   :  { %3433 = vtanh.f32 %v3306_v53 }
 0x6c1   :  { %v3428_v54 = vpop.eup %3427 }
 0x6c2   :  { %v3430_v55 = vpop.eup %3429  ;;  %v1497_v61 = vadd.f32 1.0, %v3428_v54 }
 0x6c3   :  { %v1503_v62 = vadd.f32 1.0, %v3430_v55  ;;  %v3432_v63 = vpop.eup %3431 }
 0x6c4   :  { %3435 = vrcp.f32 %v1497_v61  ;;  %v3434_v2 = vpop.eup %3433  ;;  %v1510_v10 = vadd.f32 1.0, %v3432_v63 }
 0x6c5   :  { %3437 = vrcp.f32 %v1503_v62 }
 0x6c6   :  { %3439 = vrcp.f32 %v1510_v10 }
 0x6ce   :  { %v3436_v8 = vpop.eup %3435 }
 0x6cf   :  { %v3438_v9 = vpop.eup %3437  ;;  %v1514_v21 = vmul.f32 %v3436_v8, %v3434_v2 }
 0x6d0   :  { %v1513_v27 = vmul.f32 %v3438_v9, %v4184_v11  ;;  %v3440_v31 = vpop.eup %3439 }
 0x6d2   :  { %v4230_v12 = vadd.f32 %v1514_v21, %v1513_v27 }
 0x6d4   :  { %3441 = vtanh.f32 %v4230_v12 }
 0x6de   :  { %v3442_v20 = vpop.eup %3441 }
 0x6df   :  { %v4233_v34 = vmul.f32 %v3442_v20, %v3440_v31 }
 0x6e1   :  { %1583 = vmatmul.mubr.f32.vlgmr.msra.gmra.mrb[10].mxu1 %v4233_v34  ;;  %1654 = vmatmul.mubr.f32.vlgmr.msra.gmra.mrb[18].mxu0 %v4233_v34 }
 0x6e2   :  { %3077 = vmatpush1.bf16.msra.mxu1 %v3870_v28  ;;  %3109 = vmatpush1.bf16.msra.mxu0 %v3872_v29 }
 0x6e3   :  { %3079 = vmatprep.subr.bf16.mxu1 %v3874_v36  ;;  %3111 = vmatprep.subr.bf16.mxu0 %v3876_v37 }
 0x6e4   :  { %1752 = vmatprep.mubr.f32.mxu1 %v3688_v17  ;;  %1823 = vmatprep.mubr.f32.mxu0 %v3688_v17 }
 0x6e6   :  { %3081 = vmatpush1.bf16.msra.mxu1 %v3880_v42  ;;  %3113 = vmatpush1.bf16.msra.mxu0 %v3882_v43 }
 0x6e7   :  { %3083 = vmatprep.subr.bf16.mxu1 %v3888_v50  ;;  %3115 = vmatprep.subr.bf16.mxu0 %v3890_v51 }
 0x6ea   :  { %3085 = vmatpush1.bf16.msra.mxu1 %v3894_v56  ;;  %3117 = vmatpush1.bf16.msra.mxu0 %v3896_v57 }
 0x6eb   :  { %3087 = vmatprep.subr.bf16.mxu1 %v3904_v0  ;;  %3119 = vmatprep.subr.bf16.mxu0 %v3906_v1 }
 0x6ee   :  { %3089 = vmatpush1.bf16.msra.mxu1 %v3910_v6  ;;  %3121 = vmatpush1.bf16.msra.mxu0 %v3912_v7 }
 0x6ef   :  { %3091 = vmatprep.subr.bf16.mxu1 %v3922_v14  ;;  %3123 = vmatprep.subr.bf16.mxu0 %v3924_v16 }
 0x6f2   :  { %3093 = vmatpush1.bf16.msra.mxu1 %v3928_v24  ;;  %3125 = vmatpush1.bf16.msra.mxu0 %v3930_v25 }
 0x6f3   :  { %3095 = vmatprep.subr.bf16.mxu1 %v3936_v32  ;;  %3127 = vmatprep.subr.bf16.mxu0 %v3938_v33 }
 0x6f6   :  { %3097 = vmatpush1.bf16.msra.mxu1 %v3942_v40  ;;  %3129 = vmatpush1.bf16.msra.mxu0 %v3944_v41 }
 0x6f7   :  { %3099 = vmatprep.subr.bf16.mxu1 %v3950_v48  ;;  %3131 = vmatprep.subr.bf16.mxu0 %v3952_v49 }
 0x6fa   :  { %3101 = vmatpush1.bf16.msra.mxu1 %v3958_v58  ;;  %3133 = vmatpush1.bf16.msra.mxu0 %v3960_v60 }
 0x6fb   :  { %3103 = vmatprep.subr.bf16.mxu1 %v3966_v59  ;;  %3135 = vmatprep.subr.bf16.mxu0 %v3968_v3 }
 0x6fe   :  { %3105 = vmatpush1.bf16.msra.mxu1 %v3974_v4  ;;  %3137 = vmatpush1.bf16.msra.mxu0 %v3976_v5 }
 0x6ff   :  { %3139 = vmatprep.subr.bf16.mxu1 %v3862_v15  ;;  %3171 = vmatprep.subr.bf16.mxu0 %v3866_v18 }
 0x7b4   :  { %v1584_v11 = vpop.f32.mrb[10].mxu1  ;;  %v1655_v38 = vpop.f32.mrb[18].mxu0 }
 0x7b5   :  { %v3292_v39 = vadd.f32 %v1584_v11, %v4031_v13  ;;  %v1586_v45 = vpop.f32.mrb[11].mxu1  ;;  %v1657_v46 = vpop.f32.mrb[19].mxu0  ;;  %v3308_v61 = vadd.f32 %v1655_v38, %v4040_v44 }
 0x7b6   :  { %v3293_v47 = vadd.f32 %v1586_v45, %v4033_v19  ;;  %v3309_v54 = vadd.f32 %v1657_v46, %v4037_v35  ;;  %v2034_v45 = vld [vmem:[#allocation8 + $0x20] sm:$0xff]  ;;  %v2035_v46 = vld [vmem:[#allocation8 + $0x28] sm:$0xff] }
 0x7b7   :  { %v2379_v52 = vmul.f32 -1.442695, %v3292_v39 }
 0x7b8   :  { %v2380_v53 = vmul.f32 -1.442695, %v3293_v47  ;;  %v2381_v55 = vmul.f32 -1.442695, %v3309_v54  ;;  %v3210_v47 = vpack.c.bf16 %v2035_v46, %v2034_v45 }
 0x7b9   :  { %3443 = vpow2.f32 %v2379_v52  ;;  %v2036_v52 = vld [vmem:[#allocation8 + $0x30] sm:$0xff] }
 0x7ba   :  { %3445 = vpow2.f32 %v2380_v53  ;;  %v2037_v53 = vld [vmem:[#allocation8 + $0x38] sm:$0xff] }
 0x7bb   :  { %3447 = vpow2.f32 %v2381_v55  ;;  %v3214_v54 = vpack.c.bf16 %v2037_v53, %v2036_v52  ;;  %v2038_v55 = vld [vmem:[#allocation8 + $0x40] sm:$0xff] }
 0x7bc   :  { %3449 = vtanh.f32 %v3308_v61  ;;  %v2039_v61 = vld [vmem:[#allocation8 + $0x48] sm:$0xff] }
 0x7c3   :  { %v3444_v15 = vpop.eup %3443 }
 0x7c4   :  { %v3446_v62 = vpop.eup %3445  ;;  %v1667_v18 = vadd.f32 1.0, %v3444_v15  ;;  %v3218_v15 = vpack.c.bf16 %v2039_v61, %v2038_v55 }
 0x7c5   :  { %v1673_v63 = vadd.f32 1.0, %v3446_v62  ;;  %v3448_v2 = vpop.eup %3447  ;;  %v2040_v62 = vld [vmem:[#allocation8 + $0x50] sm:$0xff] }
 0x7c6   :  { %3451 = vrcp.f32 %v1667_v18  ;;  %v3450_v8 = vpop.eup %3449  ;;  %v1680_v27 = vadd.f32 1.0, %v3448_v2  ;;  %v2041_v18 = vld [vmem:[#allocation8 + $0x58] sm:$0xff]  ;;  %v2042_v2 = vld [vmem:[#allocation8 + $0x60] sm:$0xff] }
 0x7c7   :  { %3453 = vrcp.f32 %v1673_v63  ;;  %v3222_v63 = vpack.c.bf16 %v2041_v18, %v2040_v62 }
 0x7c8   :  { %3455 = vrcp.f32 %v1680_v27  ;;  %v2166_v27 = vld [vmem:[#allocation10] sm:$0xff] }
 0x7d0   :  { %v3452_v9 = vpop.eup %3451 }
 0x7d1   :  { %v3454_v21 = vpop.eup %3453  ;;  %v1684_v10 = vmul.f32 %v3452_v9, %v3450_v8  ;;  %v2043_v8 = vld [vmem:[#allocation8 + $0x68] sm:$0xff]  ;;  %v2044_v9 = vld [vmem:[#allocation8 + $0x70] sm:$0xff] }
 0x7d2   :  { %v1683_v31 = vmul.f32 %v3454_v21, %v4230_v12  ;;  %v3456_v11 = vpop.eup %3455  ;;  %v2045_v21 = vld [vmem:[#allocation8 + $0x78] sm:$0xff] }
 0x7d4   :  { %v4276_v20 = vadd.f32 %v1684_v10, %v1683_v31  ;;  %v3230_v10 = vpack.c.bf16 %v2045_v21, %v2044_v9  ;;  %v2167_v31 = vld [vmem:[#allocation10 + $0x8] sm:$0xff] }
 0x7d6   :  { %3457 = vtanh.f32 %v4276_v20 }
 0x7e0   :  { %v3458_v38 = vpop.eup %3457 }
 0x7e1   :  { %v4279_v39 = vmul.f32 %v3458_v38, %v3456_v11  ;;  %v2168_v11 = vld [vmem:[#allocation10 + $0x10] sm:$0xff]  ;;  %v2169_v38 = vld [vmem:[#allocation10 + $0x18] sm:$0xff] }
 0x7e3   :  { %1753 = vmatmul.mubr.f32.vlgmr.msra.gmra.mrb[12].mxu1 %v4279_v39  ;;  %1824 = vmatmul.mubr.f32.vlgmr.msra.gmra.mrb[20].mxu0 %v4279_v39 }
 0x7e4   :  { %3141 = vmatpush1.bf16.msra.mxu1 %v3870_v28  ;;  %3173 = vmatpush1.bf16.msra.mxu0 %v3872_v29  ;;  %v2031_v28 = vld [vmem:[#allocation8 + $0x8] sm:$0xff] }
 0x7e5   :  { %3143 = vmatprep.subr.bf16.mxu1 %v3874_v36  ;;  %3175 = vmatprep.subr.bf16.mxu0 %v3876_v37 }
 0x7e6   :  { %1922 = vmatprep.mubr.f32.mxu1 %v3688_v17  ;;  %1993 = vmatprep.mubr.f32.mxu0 %v3688_v17  ;;  %v2030_v17 = vld [vmem:[#allocation8] sm:$0xff] }
 0x7e7   :  { %v3202_v29 = vpack.c.bf16 %v2031_v28, %v2030_v17  ;;  %v3238_v17 = vpack.c.bf16 %v2169_v38, %v2168_v11 }
 0x7e8   :  { %3145 = vmatpush1.bf16.msra.mxu1 %v3880_v42  ;;  %3177 = vmatpush1.bf16.msra.mxu0 %v3882_v43 }
 0x7e9   :  { %3147 = vmatprep.subr.bf16.mxu1 %v3888_v50  ;;  %3179 = vmatprep.subr.bf16.mxu0 %v3890_v51 }
 0x7ec   :  { %3149 = vmatpush1.bf16.msra.mxu1 %v3894_v56  ;;  %3181 = vmatpush1.bf16.msra.mxu0 %v3896_v57 }
 0x7ed   :  { %3151 = vmatprep.subr.bf16.mxu1 %v3904_v0  ;;  %3183 = vmatprep.subr.bf16.mxu0 %v3906_v1 }
 0x7f0   :  { %3153 = vmatpush1.bf16.msra.mxu1 %v3910_v6  ;;  %3185 = vmatpush1.bf16.msra.mxu0 %v3912_v7 }
 0x7f1   :  { %3155 = vmatprep.subr.bf16.mxu1 %v3922_v14  ;;  %3187 = vmatprep.subr.bf16.mxu0 %v3924_v16 }
 0x7f4   :  { %3157 = vmatpush1.bf16.msra.mxu1 %v3928_v24  ;;  %3189 = vmatpush1.bf16.msra.mxu0 %v3930_v25 }
 0x7f5   :  { %3159 = vmatprep.subr.bf16.mxu1 %v3936_v32  ;;  %3191 = vmatprep.subr.bf16.mxu0 %v3938_v33 }
 0x7f8   :  { %3161 = vmatpush1.bf16.msra.mxu1 %v3942_v40  ;;  %3193 = vmatpush1.bf16.msra.mxu0 %v3944_v41 }
 0x7f9   :  { %3163 = vmatprep.subr.bf16.mxu1 %v3950_v48  ;;  %3195 = vmatprep.subr.bf16.mxu0 %v3952_v49 }
 0x7fc   :  { %3165 = vmatpush1.bf16.msra.mxu1 %v3958_v58  ;;  %3197 = vmatpush1.bf16.msra.mxu0 %v3960_v60  ;;  %v2032_v60 = vld [vmem:[#allocation8 + $0x10] sm:$0xff] }
 0x7fd   :  { %3167 = vmatprep.subr.bf16.mxu1 %v3966_v59  ;;  %3199 = vmatprep.subr.bf16.mxu0 %v3968_v3  ;;  %v2033_v59 = vld [vmem:[#allocation8 + $0x18] sm:$0xff] }
 0x7fe   :  { %v3206_v12 = vpack.c.bf16 %v2033_v59, %v2032_v60 }
 0x800   :  { %3169 = vmatpush1.bf16.msra.mxu1 %v3974_v4  ;;  %3201 = vmatpush1.bf16.msra.mxu0 %v3976_v5 }
 0x801   :  { %3203 = vmatprep.subr.bf16.mxu1 %v3202_v29 }
 0x8b6   :  { %v1754_v36 = vpop.f32.mrb[12].mxu1  ;;  %v1825_v37 = vpop.f32.mrb[20].mxu0 }
 0x8b7   :  { %v3294_v42 = vadd.f32 %v1754_v36, %v4031_v13  ;;  %v1756_v43 = vpop.f32.mrb[13].mxu1  ;;  %v1827_v50 = vpop.f32.mrb[21].mxu0  ;;  %v3310_v6 = vadd.f32 %v1825_v37, %v4040_v44  ;;  %v2175_v36 = vld [vmem:[#allocation10 + $0x48] sm:$0xff] }
 0x8b8   :  { %v3295_v51 = vadd.f32 %v1756_v43, %v4033_v19  ;;  %v3311_v0 = vadd.f32 %v1827_v50, %v4037_v35  ;;  %v2177_v43 = vld [vmem:[#allocation10 + $0x58] sm:$0xff] }
 0x8b9   :  { %v2382_v56 = vmul.f32 -1.442695, %v3294_v42  ;;  %v2176_v42 = vld [vmem:[#allocation10 + $0x50] sm:$0xff] }
 0x8ba   :  { %v2383_v57 = vmul.f32 -1.442695, %v3295_v51  ;;  %v2384_v1 = vmul.f32 -1.442695, %v3311_v0  ;;  %v3254_v50 = vpack.c.bf16 %v2177_v43, %v2176_v42  ;;  %v2178_v51 = vld [vmem:[#allocation10 + $0x60] sm:$0xff]  ;;  %v2180_v0 = vld [vmem:[#allocation10 + $0x70] sm:$0xff] }
 0x8bb   :  { %3459 = vpow2.f32 %v2382_v56  ;;  %v2179_v56 = vld [vmem:[#allocation10 + $0x68] sm:$0xff] }
 0x8bc   :  { %3461 = vpow2.f32 %v2383_v57  ;;  %v3258_v57 = vpack.c.bf16 %v2179_v56, %v2178_v51 }
 0x8bd   :  { %3463 = vpow2.f32 %v2384_v1  ;;  %v2181_v1 = vld [vmem:[#allocation10 + $0x78] sm:$0xff] }
 0x8be   :  { %3465 = vtanh.f32 %v3310_v6  ;;  %v3262_v6 = vpack.c.bf16 %v2181_v1, %v2180_v0 }
 0x8c5   :  { %v3460_v7 = vpop.eup %3459 }
 0x8c6   :  { %v3462_v14 = vpop.eup %3461  ;;  %v1837_v16 = vadd.f32 1.0, %v3460_v7 }
 0x8c7   :  { %v1843_v24 = vadd.f32 1.0, %v3462_v14  ;;  %v3464_v25 = vpop.eup %3463 }
 0x8c8   :  { %3467 = vrcp.f32 %v1837_v16  ;;  %v3466_v32 = vpop.eup %3465  ;;  %v1850_v48 = vadd.f32 1.0, %v3464_v25 }
 0x8c9   :  { %3469 = vrcp.f32 %v1843_v24 }
 0x8ca   :  { %3471 = vrcp.f32 %v1850_v48 }
 0x8d2   :  { %v3468_v33 = vpop.eup %3467 }
 0x8d3   :  { %v3470_v40 = vpop.eup %3469  ;;  %v1854_v41 = vmul.f32 %v3468_v33, %v3466_v32 }
 0x8d4   :  { %v1853_v49 = vmul.f32 %v3470_v40, %v4276_v20  ;;  %v3472_v3 = vpop.eup %3471  ;;  %v3234_v20 = vpack.c.bf16 %v2167_v31, %v2166_v27 }
 0x8d6   :  { %v4320_v58 = vadd.f32 %v1854_v41, %v1853_v49  ;;  %3235 = vmatprep.subr.bf16.mxu0 %v3234_v20 }
 0x8d8   :  { %3473 = vtanh.f32 %v4320_v58 }
 0x8e2   :  { %v3474_v4 = vpop.eup %3473 }
 0x8e3   :  { %v1857_v5 = vmul.f32 %v3474_v4, %v3472_v3 }
 0x8e5   :  { %1923 = vmatmul.mubr.f32.vlgmr.msra.gmra.mrb[14].mxu1 %v1857_v5  ;;  %1994 = vmatmul.mubr.f32.vlgmr.msra.gmra.mrb[22].mxu0 %v1857_v5 }
 0x8e6   :  { %3205 = vmatpush3.bf16.msra.mxu1 %v3202_v29  ;;  %2538 = vmatprep.mubr.f32.mxu1 %v4049_v22  ;;  %v3226_v22 = vpack.c.bf16 %v2043_v8, %v2042_v2  ;;  %v2174_v29 = vld [vmem:[#allocation10 + $0x40] sm:$0xff] }
 0x8e7   :  { %3207 = vmatprep.subr.bf16.mxu1 %v3206_v12  ;;  %3237 = vmatpush3.bf16.msra.mxu0 %v3234_v20  ;;  %v3250_v37 = vpack.c.bf16 %v2175_v36, %v2174_v29 }
 0x8e8   :  { %3239 = vmatprep.subr.bf16.mxu0 %v3238_v17 }
 0x8ea   :  { %3209 = vmatpush3.bf16.msra.mxu1 %v3206_v12 }
 0x8eb   :  { %3211 = vmatprep.subr.bf16.mxu1 %v3210_v47  ;;  %3241 = vmatpush3.bf16.msra.mxu0 %v3238_v17 }
 0x8ee   :  { %3213 = vmatpush3.bf16.msra.mxu1 %v3210_v47 }
 0x8ef   :  { %3215 = vmatprep.subr.bf16.mxu1 %v3214_v54 }
 0x8f2   :  { %3217 = vmatpush3.bf16.msra.mxu1 %v3214_v54 }
 0x8f3   :  { %3219 = vmatprep.subr.bf16.mxu1 %v3218_v15 }
 0x8f6   :  { %3221 = vmatpush3.bf16.msra.mxu1 %v3218_v15 }
 0x8f7   :  { %3223 = vmatprep.subr.bf16.mxu1 %v3222_v63 }
 0x8fa   :  { %3225 = vmatpush3.bf16.msra.mxu1 %v3222_v63 }
 0x8fb   :  { %3227 = vmatprep.subr.bf16.mxu1 %v3226_v22 }
 0x8fe   :  { %3229 = vmatpush3.bf16.msra.mxu1 %v3226_v22 }
 0x8ff   :  { %3231 = vmatprep.subr.bf16.mxu1 %v3230_v10 }
 0x902   :  { %3233 = vmatpush3.bf16.msra.mxu1 %v3230_v10 }
 0x903   :  { %3266 = vmatprep.subr.bf16.mxu1 %v3234_v20 }
 0x905   :  { %2539 = vmatmul.mubr.f32.vlgmr.msra.gmra.mrb[16].mxu1 %v4095_v23  ;;  %v2170_v23 = vld [vmem:[#allocation10 + $0x20] sm:$0xff] }
 0x906   :  { %2541 = vmatprep.mubr.f32.mxu1 %v4141_v26  ;;  %3274 = vmatpush3.bf16.msra.mxu1 %v3234_v20  ;;  %v2171_v26 = vld [vmem:[#allocation10 + $0x28] sm:$0xff] }
 0x907   :  { %3267 = vmatprep.subr.bf16.mxu1 %v3238_v17 }
 0x909   :  { %2542 = vmatmul.mubr.f32.gmra.mrb[18].mxu1 %v4187_v30  ;;  %v3242_v30 = vpack.c.bf16 %v2171_v26, %v2170_v23 }
 0x90a   :  { %2544 = vmatprep.mubr.f32.mxu1 %v4233_v34  ;;  %3275 = vmatpush3.bf16.msra.mxu1 %v3238_v17  ;;  %v2172_v34 = vld [vmem:[#allocation10 + $0x30] sm:$0xff]  ;;  %v4340_v17 = vld [vmem:[%s4397_s8] ss:$0 sm:$0xff]  ;;  %s3689_s8 = smov [#allocation12]  }
 0x90b   :  { %3243 = vmatprep.subr.bf16.mxu0 %v3242_v30  ;;  %3268 = vmatprep.subr.bf16.mxu1 %v3242_v30  ;;  %s2320_s2 = sshll.u32 %s3689_s8, 4  ;;  %s2321_s2 = int_to_ptr.vmem [resolvable:$true] %s2320_s2 }
 0x90c   :  { %3245 = vmatpush3.bf16.msra.mxu0 %v3242_v30  ;;  %s3601_s29 = scalar_lea.vmem %s2321_s2, 128  ;;  %p3606_p13 = scmp.lt.s32.totalorder %s2321_s2, %s2321_s2 }
 0x90d   :  { %2545 = vmatmul.mubr.f32.gmra.mrb[20].mxu1 %v4279_v39  ;;  %v2173_v39 = vld [vmem:[#allocation10 + $0x38] sm:$0xff]  ;;  %p3602_p12 = scmp.ne.s32.totalorder %s2321_s2, %s3601_s29  ;;  %p3607_p0 = scmp.lt.s32.totalorder %s3601_s29, %s3601_s29 }
 0x90e   :  { %2547 = vmatprep.mubr.f32.mxu1 %v1857_v5  ;;  %3276 = vmatpush3.bf16.msra.mxu1 %v3242_v30  ;;  %v3246_v28 = vpack.c.bf16 %v2173_v39, %v2172_v34 }
 0x90f   :  { %p3608_p1 = por %p3607_p0, %p3606_p13 }
 0x910   :  { %3247 = vmatprep.subr.bf16.mxu0 %v3246_v28  ;;  %3269 = vmatprep.subr.bf16.mxu1 %v3246_v28 }
 0x911   :  { %3249 = vmatpush3.bf16.msra.mxu0 %v3246_v28  ;;  %p3609_p2 = pnand %p3608_p1, %p3602_p12 }
 0x912   :  { %3277 = vmatpush3.bf16.msra.mxu1 %v3246_v28  ;;  %3251 = vmatprep.subr.bf16.mxu0 %v3250_v37 }
 0x913   :  { %3270 = vmatprep.subr.bf16.mxu1 %v3250_v37 }
 0x915   :  { %3253 = vmatpush3.bf16.msra.mxu0 %v3250_v37 }
 0x916   :  { %3278 = vmatpush3.bf16.msra.mxu1 %v3250_v37  ;;  %3255 = vmatprep.subr.bf16.mxu0 %v3254_v50 }
 0x917   :  { %3271 = vmatprep.subr.bf16.mxu1 %v3254_v50 }
 0x919   :  { %3257 = vmatpush3.bf16.msra.mxu0 %v3254_v50 }
 0x91a   :  { %3279 = vmatpush3.bf16.msra.mxu1 %v3254_v50  ;;  %3259 = vmatprep.subr.bf16.mxu0 %v3258_v57 }
 0x91b   :  { %3272 = vmatprep.subr.bf16.mxu1 %v3258_v57 }
 0x91d   :  { %3261 = vmatpush3.bf16.msra.mxu0 %v3258_v57 }
 0x91e   :  { %3280 = vmatpush3.bf16.msra.mxu1 %v3258_v57  ;;  %3263 = vmatprep.subr.bf16.mxu0 %v3262_v6 }
 0x91f   :  { %3273 = vmatprep.subr.bf16.mxu1 %v3262_v6 }
 0x921   :  { %3265 = vmatpush3.bf16.msra.mxu0 %v3262_v6 }
 0x922   :  { %3281 = vmatpush3.bf16.msra.mxu1 %v3262_v6 }
 0x9b8   :  { %v1924_v7 = vpop.f32.mrb[14].mxu1  ;;  %v1995_v14 = vpop.f32.mrb[22].mxu0 }
 0x9b9   :  { %v3296_v16 = vadd.f32 %v1924_v7, %v4031_v13  ;;  %v1926_v24 = vpop.f32.mrb[15].mxu1  ;;  %v1997_v25 = vpop.f32.mrb[23].mxu0  ;;  %v3312_v49 = vadd.f32 %v1995_v14, %v4040_v44 }
 0x9ba   :  { %v3297_v32 = vadd.f32 %v1926_v24, %v4033_v19  ;;  %v3313_v41 = vadd.f32 %v1997_v25, %v4037_v35  ;;  %v2388_v35 = vld [vmem:[%s4395_s6] ss:$0 sm:$0xff] }
 0x9bb   :  { %v2385_v33 = vmul.f32 -1.442695, %v3296_v16 }
 0x9bc   :  { %v2386_v40 = vmul.f32 -1.442695, %v3297_v32  ;;  %v2387_v48 = vmul.f32 -1.442695, %v3313_v41 }
 0x9bd   :  { %3475 = vpow2.f32 %v2385_v33 }
 0x9be   :  { %3477 = vpow2.f32 %v2386_v40 }
 0x9bf   :  { %3479 = vpow2.f32 %v2387_v48 }
 0x9c0   :  { %3481 = vtanh.f32 %v3312_v49 }
 0x9c7   :  { %v3476_v60 = vpop.eup %3475 }
 0x9c8   :  { %v3478_v59 = vpop.eup %3477  ;;  %v2007_v3 = vadd.f32 1.0, %v3476_v60 }
 0x9c9   :  { %v2013_v4 = vadd.f32 1.0, %v3478_v59  ;;  %v3480_v13 = vpop.eup %3479 }
 0x9ca   :  { %3483 = vrcp.f32 %v2007_v3  ;;  %v3482_v5 = vpop.eup %3481  ;;  %v2020_v46 = vadd.f32 1.0, %v3480_v13 }
 0x9cb   :  { %3485 = vrcp.f32 %v2013_v4 }
 0x9cc   :  { %3487 = vrcp.f32 %v2020_v46 }
 0x9d4   :  { %v3484_v19 = vpop.eup %3483 }
 0x9d5   :  { %v3486_v12 = vpop.eup %3485  ;;  %v2024_v45 = vmul.f32 %v3484_v19, %v3482_v5 }
 0x9d6   :  { %v2023_v47 = vmul.f32 %v3486_v12, %v4320_v58  ;;  %v3488_v10 = vpop.eup %3487 }
 0x9d8   :  { %v2540_v44 = vpop.f32.mrb[16].mxu1  ;;  %v2025_v52 = vadd.f32 %v2024_v45, %v2023_v47 }
 0x9d9   :  { %v2125_v53 = vadd.f32 %v2540_v44, %v2388_v35  ;;  %v2119_v54 = vpop.f32.mrb[17].mxu1 }
 0x9da   :  { %v2120_v55 = vadd.f32 %v2388_v35, %v2119_v54  ;;  %3489 = vtanh.f32 %v2025_v52  ;;  %2029 = vst [vmem:[#allocation14] sm:$0xff] %v2025_v52 }
 0x9db   :  { %v2159_v62 = vmax.f32 %v2125_v53, 0.0 }
 0x9dc   :  { %v2158_v61 = vmax.f32 %v2120_v55, 0.0  ;;  %v2543_v15 = vpop.f32.mrb[18].mxu1 }
 0x9dd   :  { %v2135_v18 = vadd.f32 %v2543_v15, %v2388_v35  ;;  %v2129_v63 = vpop.f32.mrb[19].mxu1 }
 0x9de   :  { %v2130_v2 = vadd.f32 %v2388_v35, %v2129_v63  ;;  %2582 = vmatprep.mubr.f32.mxu0 %v2158_v61 }
 0x9df   :  { %2583 = vmatmul.mubr.f32.vlgmr.msra.gmra.mrb[24].mxu0 %v2159_v62  ;;  %v2161_v22 = vmax.f32 %v2135_v18, 0.0 }
 0x9e0   :  { %v2160_v58 = vmax.f32 %v2130_v2, 0.0  ;;  %v2546_v8 = vpop.f32.mrb[20].mxu1 }
 0x9e1   :  { %v2139_v9 = vpop.f32.mrb[21].mxu1  ;;  %v2145_v31 = vadd.f32 %v2546_v8, %v2388_v35 }
 0x9e2   :  { %v2140_v21 = vadd.f32 %v2388_v35, %v2139_v9  ;;  %2585 = vmatprep.mubr.f32.mxu0 %v2160_v58 }
 0x9e3   :  { %2586 = vmatmul.mubr.f32.gmra.mrb[26].mxu0 %v2161_v22  ;;  %v2163_v38 = vmax.f32 %v2145_v31, 0.0 }
 0x9e4   :  { %v3490_v27 = vpop.eup %3489  ;;  %v2162_v11 = vmax.f32 %v2140_v21, 0.0 }
 0x9e5   :  { %v2027_v20 = vmul.f32 %v3490_v27, %v3488_v10 }
 0x9e7   :  { %2548 = vmatmul.mubr.f32.gmra.mrb[22].mxu1 %v2027_v20  ;;  %2028 = vst [vmem:[#allocation12] sm:$0xff] %v2027_v20 }
 0x9e8   :  { %2588 = vmatprep.mubr.f32.mxu1 %v2162_v11 }
 0x9eb   :  { %2589 = vmatmul.mubr.f32.vlgmr.msra.gmra.mrb[24].mxu1 %v2163_v38 }
 0xab2   :  { %v2584_v23 = vpop.f32.mrb[24].mxu0 }
 0xab3   :  { %v2261_v26 = vadd.f32 %v2584_v23, %v4340_v17  ;;  %v2255_v30 = vpop.f32.mrb[25].mxu0 }
 0xab4   :  { %v2256_v34 = vadd.f32 %v4340_v17, %v2255_v30 }
 0xab5   :  { %2295 = vst [vmem:[#allocation11 + $0x8] sm:$0xff] %v2261_v26 }
 0xab6   :  { %2294 = vst [vmem:[#allocation11] sm:$0xff] %v2256_v34  ;;  %v2587_v39 = vpop.f32.mrb[26].mxu0 }
 0xab7   :  { %v2271_v28 = vadd.f32 %v2587_v39, %v4340_v17  ;;  %v2265_v29 = vpop.f32.mrb[27].mxu0 }
 0xab8   :  { %v2266_v36 = vadd.f32 %v4340_v17, %v2265_v29 }
 0xab9   :  { %2297 = vst [vmem:[#allocation11 + $0x18] sm:$0xff] %v2271_v28 }
 0xaba   :  { %2296 = vst [vmem:[#allocation11 + $0x10] sm:$0xff] %v2266_v36  ;;  %v2549_v37 = vpop.f32.mrb[22].mxu1 }
 0xabb   :  { %v2155_v42 = vadd.f32 %v2549_v37, %v2388_v35  ;;  %v2149_v43 = vpop.f32.mrb[23].mxu1 }
 0xabc   :  { %v2150_v50 = vadd.f32 %v2388_v35, %v2149_v43 }
 0xabd   :  { %v2165_v57 = vmax.f32 %v2155_v42, 0.0 }
 0xabe   :  { %v2164_v51 = vmax.f32 %v2150_v50, 0.0  ;;  %v2590_v56 = vpop.f32.mrb[24].mxu1 }
 0xabf   :  { %v2281_v0 = vadd.f32 %v2590_v56, %v4340_v17  ;;  %v2275_v1 = vpop.f32.mrb[25].mxu1 }
 0xac0   :  { %v2276_v6 = vadd.f32 %v4340_v17, %v2275_v1  ;;  %2591 = vmatprep.mubr.f32.mxu1 %v2164_v51 }
 0xac1   :  { %2299 = vst [vmem:[#allocation11 + $0x28] sm:$0xff] %v2281_v0  ;;  %2592 = vmatmul.mubr.f32.gmra.mrb[26].mxu1 %v2165_v57 }
 0xac2   :  { %2298 = vst [vmem:[#allocation11 + $0x20] sm:$0xff] %v2276_v6 }
 0xac3   :  { %3612 = shalt.err (!%p3609_p2)
}
 0xac4   :  { %s3613_s21 = scalar_lea.hbm %s4401_s12, 128 }
 0xac5   :  { %p3614_p3 = scmp.ne.s32.totalorder %s4401_s12, %s3613_s21  ;;  %p3617_p4 = scmp.lt.u32.totalorder %s3613_s21, %s4401_s12 }
 0xac7   :  { %p3619_p5 = pnand %p3617_p4, %p3614_p3 }
 0xac9   :  { %3622 = shalt.err (!%p3619_p5)
}
 0xaca   :  { %2323 = dma.vmem_to_hbm [thread:$0]  %s2321_s2, 128, %s4401_s12, [#allocation13]  }
 0xacb   :  { %s3690_s16 = smov [#allocation14]  }
 0xacc   :  { %s2330_s20 = sshll.u32 %s3690_s16, 4  ;;  %s2331_s20 = int_to_ptr.vmem [resolvable:$true] %s2330_s20 }
 0xacd   :  { %s3623_s22 = scalar_lea.vmem %s2331_s20, 128  ;;  %p3628_p7 = scmp.lt.s32.totalorder %s2331_s20, %s2331_s20 }
 0xace   :  { %p3624_p6 = scmp.ne.s32.totalorder %s2331_s20, %s3623_s22  ;;  %p3629_p8 = scmp.lt.s32.totalorder %s3623_s22, %s3623_s22 }
 0xad0   :  { %p3630_p9 = por %p3629_p8, %p3628_p7 }
 0xad2   :  { %p3631_p10 = pnand %p3630_p9, %p3624_p6 }
 0xad4   :  { %3634 = shalt.err (!%p3631_p10)
}
 0xad5   :  { %s3635_s27 = scalar_lea.hbm %s4402_s13, 128 }
 0xad6   :  { %p3636_p11 = scmp.ne.s32.totalorder %s4402_s13, %s3635_s27  ;;  %p3639_p12 = scmp.lt.u32.totalorder %s3635_s27, %s4402_s13 }
 0xad8   :  { %p3641_p13 = pnand %p3639_p12, %p3636_p11 }
 0xada   :  { %3644 = shalt.err (!%p3641_p13)
}
 0xadb   :  { %2333 = dma.vmem_to_hbm [thread:$0]  %s2331_s20, 128, %s4402_s13, [#allocation13]  }
 0xadc   :  { %s3691_s18 = smov [#allocation11]  }
 0xadd   :  { %s2307_s6 = sshll.u32 %s3691_s18, 4  ;;  %s2308_s6 = int_to_ptr.vmem [resolvable:$true] %s2307_s6 }
 0xade   :  { %s3645_s19 = scalar_lea.vmem %s2308_s6, 1024  ;;  %p3650_p1 = scmp.lt.s32.totalorder %s2308_s6, %s2308_s6 }
 0xadf   :  { %p3646_p0 = scmp.ne.s32.totalorder %s2308_s6, %s3645_s19  ;;  %p3651_p2 = scmp.lt.s32.totalorder %s3645_s19, %s3645_s19 }
 0xae1   :  { %p3652_p3 = por %p3651_p2, %p3650_p1 }
 0xae3   :  { %p3653_p4 = pnand %p3652_p3, %p3646_p0 }
 0xb94   :  { %v2593_v7 = vpop.f32.mrb[26].mxu1 }
 0xb95   :  { %v2291_v14 = vadd.f32 %v2593_v7, %v4340_v17  ;;  %v2285_v16 = vpop.f32.mrb[27].mxu1 }
 0xb96   :  { %v2286_v24 = vadd.f32 %v4340_v17, %v2285_v16 }
 0xb97   :  { %2301 = vst [vmem:[#allocation11 + $0x38] sm:$0xff] %v2291_v14 }
 0xb98   :  { %2300 = vst [vmem:[#allocation11 + $0x30] sm:$0xff] %v2286_v24 }
 0xb99   :  { %3656 = shalt.err (!%p3653_p4)
}
 0xb9a   :  { %s3657_s2 = scalar_lea.hbm %s4400_s11, 1024 }
 0xb9b   :  { %p3658_p5 = scmp.ne.s32.totalorder %s4400_s11, %s3657_s2  ;;  %p3661_p6 = scmp.lt.u32.totalorder %s3657_s2, %s4400_s11 }
 0xb9d   :  { %p3663_p7 = pnand %p3661_p6, %p3658_p5 }
 0xb9f   :  { %3666 = shalt.err (!%p3663_p7)
}
 0xba0   :  { %2313 = dma.vmem_to_hbm [thread:$0]  %s2308_s6, 1024, %s4400_s11, [#allocation4], %s3682_s26, %s3682_s26, %s3683_s17  }
 0xba1   :  { %3673 = dma.done.wait [#allocation4], 1024  }
 0xba2   :  { %3674 = vsyncadd [#allocation4], 4294966272 }
 0xba3   :  { %3675 = dma.done.wait [#allocation13], 256  }
 0xba4   :  { %3676 = vsyncadd [#allocation13], 4294967040 }
 0xba5   :  { %2343 = vsyncpa [#allocation3], 1 }
 0xba6   :  { %2344 = vsyncpa [#allocation6], 1 }
 0xba7   :  { %2345 = vsyncpa [#allocation9], 1 }
 0xba8   :  { %2346 = vsyncpa [#allocation4], 1 }
 0xba9   :  { %2347 = vsyncpa [#allocation13], 1 }

</bundles_post_ra>
